<compile_context>
chip_gen: v6e
topology: v6e:2x2x1
jax: 0.10.0
libtpu: 0.0.40
codegen_flags: <defaults>
</compile_context>

<pallas_src>
import math

import jax
import jax.numpy as jnp
from jax import lax
from jax.experimental import pallas as pl
from jax.experimental.pallas import tpu as pltpu

INPUT_SIZE = 2
HIDDEN1 = 32
HIDDEN2 = 16
FC_DIM = 16
OUTPUT_SIZE = 1
OUT_PAD = 128  # lane-dense padded output width (single unmasked vst)


def _make_kernel(T, B, H1, H2):
    """Build the kernel body with static T / B baked in (full unroll)."""

    def kernel(x_ref, wih1_ref, whh1_ref, wih2_ref, whh2_ref,
               wfc1_ref, wout_ref, bias_ref, y_ref):
        wih1 = wih1_ref[...]          # (D, 4H1)   bf16
        whh1 = whh1_ref[...]          # (H1, 4H1)  bf16
        wih2 = wih2_ref[...]          # (H1, 4H2)  bf16
        whh2 = whh2_ref[...]          # (H2, 4H2)  bf16

        biases = bias_ref[...]        # (4, OUT_PAD) f32, statically sliced
        b1 = biases[0:1, 0:4 * H1]    # (1, 4H1)
        b2 = biases[1:2, 0:4 * H2]    # (1, 4H2)
        bfc1 = biases[2:3, 0:FC_DIM]  # (1, FC_DIM)
        bout = biases[3:4, :]         # (1, OUT_PAD)

        # Hoisted broadcast: one broadcast_in_dim instead of T of them.
        b2b = jnp.broadcast_to(b2, (B, 4 * H2))

        # Hoisted layer-1 input projection for every (t, b) row at once.
        x_bf = x_ref[...].astype(jnp.bfloat16)
        xproj = (jnp.dot(x_bf, wih1, preferred_element_type=jnp.float32)
                 + b1)                # (T*B, 4H1) f32

        def cell(gates, c, H):
            # Full-width nonlinearities (f32): 2 EUP pushes per cell.
            sig = jax.nn.sigmoid(gates)
            th = jnp.tanh(gates)
            i = sig[:, 0:H]
            f = sig[:, H:2 * H]
            g = th[:, 2 * H:3 * H]
            o = sig[:, 3 * H:4 * H]
            c_new = f * c + i * g
            h_new = o * jnp.tanh(c_new)
            return h_new, c_new

        h1 = jnp.zeros((B, H1), jnp.float32)
        c1 = jnp.zeros((B, H1), jnp.float32)
        h2 = jnp.zeros((B, H2), jnp.float32)
        c2 = jnp.zeros((B, H2), jnp.float32)

        h2_steps = []
        for t in range(T):            # static full unroll (T small & fixed)
            # Depends only on the *previous* step's h2 -> overlaps with layer 1.
            g2_hh = jnp.dot(h2.astype(jnp.bfloat16), whh2,
                            preferred_element_type=jnp.float32)

            g1 = (xproj[t * B:(t + 1) * B, :]
                  + jnp.dot(h1.astype(jnp.bfloat16), whh1,
                            preferred_element_type=jnp.float32))
            h1, c1 = cell(g1, c1, H1)
            # dropout1: identity (eval mode)

            g2 = (jnp.dot(h1.astype(jnp.bfloat16), wih2,
                          preferred_element_type=jnp.float32)
                  + g2_hh + b2b)
            h2, c2 = cell(g2, c2, H2)
            h2_steps.append(h2)

        # dropout2: identity (eval mode); MLP head over all T*B rows at once
        # (f32 — single pass, off the serial critical path).
        hs = jnp.concatenate(h2_steps, axis=0)                      # (T*B, H2)
        hidden = jnp.dot(hs, wfc1_ref[...], preferred_element_type=jnp.float32)
        hidden = jnp.maximum(hidden + bfc1, 0.0)                    # ReLU
        y = jnp.dot(hidden, wout_ref[...], preferred_element_type=jnp.float32)
        y_ref[...] = y + bout                                       # (T*B, OUT_PAD)

    return kernel


def pack_params(params):
    """One-time packing: bf16 weight casts, head padding, bias-row packing.

    Done once at init so the per-call wrapper issues no param prep ops and the
    kernel sees 8 input DMAs instead of 10.
    """
    H1 = params["whh1"].shape[0]
    H2 = params["whh2"].shape[0]
    O = params["wout"].shape[1]

    biases = jnp.zeros((4, OUT_PAD), jnp.float32)
    biases = biases.at[0, :4 * H1].set(params["b1"][0])
    biases = biases.at[1, :4 * H2].set(params["b2"][0])
    biases = biases.at[2, :FC_DIM].set(params["bfc1"][0])
    biases = biases.at[3, :O].set(params["bout"][0])

    wout_p = jnp.zeros((params["wout"].shape[0], OUT_PAD), jnp.float32)
    wout_p = wout_p.at[:, :O].set(params["wout"])

    return {
        "wih1": params["wih1"].astype(jnp.bfloat16),
        "whh1": params["whh1"].astype(jnp.bfloat16),
        "wih2": params["wih2"].astype(jnp.bfloat16),
        "whh2": params["whh2"].astype(jnp.bfloat16),
        "wfc1": params["wfc1"].astype(jnp.float32),
        "wout": wout_p,
        "biases": biases,
    }


def lstm_actuator_forward(x, packed, output_size=OUTPUT_SIZE):
    """x: (B, T, input_size) float32 -> (B, T, output_size) float32.

    Note: the serial recurrence is the critical path; additional independent
    sequences batch into B essentially for free (MXU cost is flat up to
    ~128-256 rows), so grow B at the call site if possible.  Only at several
    hundred rows (v7x) is a leading parallel grid axis over B worth adding.
    """
    B, T, _ = x.shape
    H1 = packed["whh1"].shape[0]
    H2 = packed["whh2"].shape[0]

    # Time-major flatten so each step's rows are a contiguous static slice.
    x_tm = jnp.transpose(x, (1, 0, 2)).reshape(T * B, -1).astype(jnp.float32)

    vmem = pl.BlockSpec(memory_space=pltpu.MemorySpace.VMEM)
    y_pad = pl.pallas_call(
        _make_kernel(T, B, H1, H2),
        out_shape=jax.ShapeDtypeStruct((T * B, OUT_PAD), jnp.float32),
        in_specs=[vmem] * 8,
        out_specs=vmem,
    )(
        x_tm,
        packed["wih1"], packed["whh1"],
        packed["wih2"], packed["whh2"],
        packed["wfc1"], packed["wout"],
        packed["biases"],
    )

    y = y_pad[:, :output_size].reshape(T, B, output_size)
    return jnp.transpose(y, (1, 0, 2))


def init_params(key):
    """Deterministic parameter init mirroring PyTorch module shapes.

    nn.LSTM weights are stored transposed: weight_ih (4H, in) -> (in, 4H),
    biases b_ih + b_hh are pre-summed into a single (1, 4H) row.
    nn.Linear weight (out, in) -> stored as (in, out).
    """
    ks = jax.random.split(key, 12)

    def u(k, shape, bound):
        return jax.random.uniform(k, shape, jnp.float32, -bound, bound)

    s1 = 1.0 / math.sqrt(HIDDEN1)
    s2 = 1.0 / math.sqrt(HIDDEN2)
    sf = 1.0 / math.sqrt(HIDDEN2)   # fc1 fan_in
    so = 1.0 / math.sqrt(FC_DIM)    # out fan_in

    return {
        "wih1": u(ks[0], (INPUT_SIZE, 4 * HIDDEN1), s1),
        "whh1": u(ks[1], (HIDDEN1, 4 * HIDDEN1), s1),
        "b1":   u(ks[2], (1, 4 * HIDDEN1), s1) + u(ks[3], (1, 4 * HIDDEN1), s1),
        "wih2": u(ks[4], (HIDDEN1, 4 * HIDDEN2), s2),
        "whh2": u(ks[5], (HIDDEN2, 4 * HIDDEN2), s2),
        "b2":   u(ks[6], (1, 4 * HIDDEN2), s2) + u(ks[7], (1, 4 * HIDDEN2), s2),
        "wfc1": u(ks[8], (HIDDEN2, FC_DIM), sf),
        "bfc1": u(ks[9], (1, FC_DIM), sf),
        "wout": u(ks[10], (FC_DIM, OUTPUT_SIZE), so),
        "bout": u(ks[11], (1, OUTPUT_SIZE), so),
    }


def reference_forward(x, p):
    """Pure-JAX f32 reference (lax.scan) for correctness checking."""
    B, T, _ = x.shape

    def cell(carry, xt, wih, whh, b, H):
        h, c = carry
        gates = xt @ wih + h @ whh + b
        i = jax.nn.sigmoid(gates[:, 0:H])
        f = jax.nn.sigmoid(gates[:, H:2 * H])
        g = jnp.tanh(gates[:, 2 * H:3 * H])
        o = jax.nn.sigmoid(gates[:, 3 * H:4 * H])
        c = f * c + i * g
        h = o * jnp.tanh(c)
        return (h, c), h

    def step(carry, xt):
        (h1, c1), (h2, c2) = carry
        (h1, c1), y1 = cell((h1, c1), xt, p["wih1"], p["whh1"], p["b1"], HIDDEN1)
        (h2, c2), y2 = cell((h2, c2), y1, p["wih2"], p["whh2"], p["b2"], HIDDEN2)
        return ((h1, c1), (h2, c2)), y2

    init = (
        (jnp.zeros((B, HIDDEN1)), jnp.zeros((B, HIDDEN1))),
        (jnp.zeros((B, HIDDEN2)), jnp.zeros((B, HIDDEN2))),
    )
    _, hs = lax.scan(step, init, jnp.transpose(x, (1, 0, 2)))  # (T, B, H2)
    hs = jnp.transpose(hs, (1, 0, 2))
    hidden = jnp.maximum(hs @ p["wfc1"] + p["bfc1"], 0.0)
    return hidden @ p["wout"] + p["bout"]


if __name__ == "__main__":
    key = jax.random.PRNGKey(0)
    kx, kp = jax.random.split(key)

    B, T = 2, 8
    x = jax.random.normal(kx, (B, T, INPUT_SIZE), jnp.float32)
    params = init_params(kp)
    packed = pack_params(params)   # one-time: bf16 casts / padding / bias pack

    y = lstm_actuator_forward(x, packed)
    y = jax.block_until_ready(y)

    y_ref = jax.block_until_ready(reference_forward(x, params))
    assert y.shape == (B, T, OUTPUT_SIZE), y.shape
    # bf16 MXU operands (f32 accumulate) -> tolerance loosened vs. the f32 run.
    assert jnp.allclose(y, y_ref, atol=5e-2, rtol=5e-2), \
        float(jnp.max(jnp.abs(y - y_ref)))

    print("KERNEL_OK")
</pallas_src>

<mosaic_0001>
module attributes {stable_mosaic.version = 11 : i64} {
  func.func @kernel(%arg0: memref<16x2xf32, #tpu.memory_space<vmem>>, %arg1: memref<2x128xbf16, #tpu.memory_space<vmem>>, %arg2: memref<32x128xbf16, #tpu.memory_space<vmem>>, %arg3: memref<32x64xbf16, #tpu.memory_space<vmem>>, %arg4: memref<16x64xbf16, #tpu.memory_space<vmem>>, %arg5: memref<16x16xf32, #tpu.memory_space<vmem>>, %arg6: memref<16x128xf32, #tpu.memory_space<vmem>>, %arg7: memref<4x128xf32, #tpu.memory_space<vmem>>, %arg8: memref<16x128xf32, #tpu.memory_space<vmem>>) attributes {dimension_semantics = [], scalar_prefetch = 0 : i64, scratch_operands = 0 : i64, tpu.core_type = #tpu.core_type<tc>} {
    %c0 = arith.constant 0 : index
    %c0_0 = arith.constant 0 : index
    %0 = vector.load %arg1[%c0, %c0_0] : memref<2x128xbf16, #tpu.memory_space<vmem>>, vector<2x128xbf16>
    %c0_1 = arith.constant 0 : index
    %c0_2 = arith.constant 0 : index
    %1 = vector.load %arg2[%c0_1, %c0_2] : memref<32x128xbf16, #tpu.memory_space<vmem>>, vector<32x128xbf16>
    %c0_3 = arith.constant 0 : index
    %c0_4 = arith.constant 0 : index
    %2 = vector.load %arg3[%c0_3, %c0_4] : memref<32x64xbf16, #tpu.memory_space<vmem>>, vector<32x64xbf16>
    %c0_5 = arith.constant 0 : index
    %c0_6 = arith.constant 0 : index
    %3 = vector.load %arg4[%c0_5, %c0_6] : memref<16x64xbf16, #tpu.memory_space<vmem>>, vector<16x64xbf16>
    %c0_7 = arith.constant 0 : index
    %c0_8 = arith.constant 0 : index
    %4 = vector.load %arg7[%c0_7, %c0_8] : memref<4x128xf32, #tpu.memory_space<vmem>>, vector<4x128xf32>
    %5 = vector.extract_strided_slice %4 {offsets = [0, 0], sizes = [1, 128], strides = [1, 1]} : vector<4x128xf32> to vector<1x128xf32>
    %6 = vector.extract_strided_slice %4 {offsets = [1, 0], sizes = [1, 64], strides = [1, 1]} : vector<4x128xf32> to vector<1x64xf32>
    %7 = vector.extract_strided_slice %4 {offsets = [2, 0], sizes = [1, 16], strides = [1, 1]} : vector<4x128xf32> to vector<1x16xf32>
    %8 = vector.extract_strided_slice %4 {offsets = [3, 0], sizes = [1, 128], strides = [1, 1]} : vector<4x128xf32> to vector<1x128xf32>
    %9 = vector.shape_cast %6 : vector<1x64xf32> to vector<1x64xf32>
    %10 = vector.broadcast %9 : vector<1x64xf32> to vector<2x64xf32>
    %c0_9 = arith.constant 0 : index
    %c0_10 = arith.constant 0 : index
    %11 = vector.load %arg0[%c0_9, %c0_10] : memref<16x2xf32, #tpu.memory_space<vmem>>, vector<16x2xf32>
    %12 = arith.truncf %11 : vector<16x2xf32> to vector<16x2xbf16>
    %cst = arith.constant dense<0.000000e+00> : vector<16x128xf32>
    %13 = tpu.matmul %12, %0, %cst {dimension_numbers = #tpu.dot_dimension_numbers<[1], [0], [0], [1], [0, 0, 1, 1], [], []>} : vector<16x2xbf16>, vector<2x128xbf16>, vector<16x128xf32> -> vector<16x128xf32>
    %14 = vector.broadcast %5 : vector<1x128xf32> to vector<16x128xf32>
    %15 = arith.addf %13, %14 : vector<16x128xf32>
    %cst_11 = arith.constant 0.000000e+00 : f32
    %16 = vector.broadcast %cst_11 : f32 to vector<2x32xf32>
    %cst_12 = arith.constant 0.000000e+00 : f32
    %17 = vector.broadcast %cst_12 : f32 to vector<2x32xf32>
    %cst_13 = arith.constant 0.000000e+00 : f32
    %18 = vector.broadcast %cst_13 : f32 to vector<2x16xf32>
    %cst_14 = arith.constant 0.000000e+00 : f32
    %19 = vector.broadcast %cst_14 : f32 to vector<2x16xf32>
    %20 = arith.truncf %18 : vector<2x16xf32> to vector<2x16xbf16>
    %cst_15 = arith.constant dense<0.000000e+00> : vector<2x64xf32>
    %21 = tpu.matmul %20, %3, %cst_15 {dimension_numbers = #tpu.dot_dimension_numbers<[1], [0], [0], [1], [0, 0, 1, 1], [], []>} : vector<2x16xbf16>, vector<16x64xbf16>, vector<2x64xf32> -> vector<2x64xf32>
    %22 = vector.extract_strided_slice %15 {offsets = [0, 0], sizes = [2, 128], strides = [1, 1]} : vector<16x128xf32> to vector<2x128xf32>
    %23 = arith.truncf %16 : vector<2x32xf32> to vector<2x32xbf16>
    %cst_16 = arith.constant dense<0.000000e+00> : vector<2x128xf32>
    %24 = tpu.matmul %23, %1, %cst_16 {dimension_numbers = #tpu.dot_dimension_numbers<[1], [0], [0], [1], [0, 0, 1, 1], [], []>} : vector<2x32xbf16>, vector<32x128xbf16>, vector<2x128xf32> -> vector<2x128xf32>
    %25 = arith.addf %22, %24 : vector<2x128xf32>
    %26 = arith.negf %25 : vector<2x128xf32>
    %27 = math.exp %26 : vector<2x128xf32>
    %cst_17 = arith.constant 1.000000e+00 : f32
    %28 = vector.broadcast %cst_17 : f32 to vector<2x128xf32>
    %29 = arith.addf %28, %27 : vector<2x128xf32>
    %30 = arith.divf %28, %29 : vector<2x128xf32>
    %31 = math.tanh %25 : vector<2x128xf32>
    %32 = vector.extract_strided_slice %30 {offsets = [0, 0], sizes = [2, 32], strides = [1, 1]} : vector<2x128xf32> to vector<2x32xf32>
    %33 = vector.extract_strided_slice %30 {offsets = [0, 32], sizes = [2, 32], strides = [1, 1]} : vector<2x128xf32> to vector<2x32xf32>
    %34 = vector.extract_strided_slice %31 {offsets = [0, 64], sizes = [2, 32], strides = [1, 1]} : vector<2x128xf32> to vector<2x32xf32>
    %35 = vector.extract_strided_slice %30 {offsets = [0, 96], sizes = [2, 32], strides = [1, 1]} : vector<2x128xf32> to vector<2x32xf32>
    %36 = arith.mulf %33, %17 : vector<2x32xf32>
    %37 = arith.mulf %32, %34 : vector<2x32xf32>
    %38 = arith.addf %36, %37 : vector<2x32xf32>
    %39 = math.tanh %38 : vector<2x32xf32>
    %40 = arith.mulf %35, %39 : vector<2x32xf32>
    %41 = arith.truncf %40 : vector<2x32xf32> to vector<2x32xbf16>
    %cst_18 = arith.constant dense<0.000000e+00> : vector<2x64xf32>
    %42 = tpu.matmul %41, %2, %cst_18 {dimension_numbers = #tpu.dot_dimension_numbers<[1], [0], [0], [1], [0, 0, 1, 1], [], []>} : vector<2x32xbf16>, vector<32x64xbf16>, vector<2x64xf32> -> vector<2x64xf32>
    %43 = arith.addf %42, %21 : vector<2x64xf32>
    %44 = arith.addf %43, %10 : vector<2x64xf32>
    %45 = arith.negf %44 : vector<2x64xf32>
    %46 = math.exp %45 : vector<2x64xf32>
    %cst_19 = arith.constant 1.000000e+00 : f32
    %47 = vector.broadcast %cst_19 : f32 to vector<2x64xf32>
    %48 = arith.addf %47, %46 : vector<2x64xf32>
    %49 = arith.divf %47, %48 : vector<2x64xf32>
    %50 = math.tanh %44 : vector<2x64xf32>
    %51 = vector.extract_strided_slice %49 {offsets = [0, 0], sizes = [2, 16], strides = [1, 1]} : vector<2x64xf32> to vector<2x16xf32>
    %52 = vector.extract_strided_slice %49 {offsets = [0, 16], sizes = [2, 16], strides = [1, 1]} : vector<2x64xf32> to vector<2x16xf32>
    %53 = vector.extract_strided_slice %50 {offsets = [0, 32], sizes = [2, 16], strides = [1, 1]} : vector<2x64xf32> to vector<2x16xf32>
    %54 = vector.extract_strided_slice %49 {offsets = [0, 48], sizes = [2, 16], strides = [1, 1]} : vector<2x64xf32> to vector<2x16xf32>
    %55 = arith.mulf %52, %19 : vector<2x16xf32>
    %56 = arith.mulf %51, %53 : vector<2x16xf32>
    %57 = arith.addf %55, %56 : vector<2x16xf32>
    %58 = math.tanh %57 : vector<2x16xf32>
    %59 = arith.mulf %54, %58 : vector<2x16xf32>
    %60 = arith.truncf %59 : vector<2x16xf32> to vector<2x16xbf16>
    %cst_20 = arith.constant dense<0.000000e+00> : vector<2x64xf32>
    %61 = tpu.matmul %60, %3, %cst_20 {dimension_numbers = #tpu.dot_dimension_numbers<[1], [0], [0], [1], [0, 0, 1, 1], [], []>} : vector<2x16xbf16>, vector<16x64xbf16>, vector<2x64xf32> -> vector<2x64xf32>
    %62 = vector.extract_strided_slice %15 {offsets = [2, 0], sizes = [2, 128], strides = [1, 1]} : vector<16x128xf32> to vector<2x128xf32>
    %63 = arith.truncf %40 : vector<2x32xf32> to vector<2x32xbf16>
    %cst_21 = arith.constant dense<0.000000e+00> : vector<2x128xf32>
    %64 = tpu.matmul %63, %1, %cst_21 {dimension_numbers = #tpu.dot_dimension_numbers<[1], [0], [0], [1], [0, 0, 1, 1], [], []>} : vector<2x32xbf16>, vector<32x128xbf16>, vector<2x128xf32> -> vector<2x128xf32>
    %65 = arith.addf %62, %64 : vector<2x128xf32>
    %66 = arith.negf %65 : vector<2x128xf32>
    %67 = math.exp %66 : vector<2x128xf32>
    %cst_22 = arith.constant 1.000000e+00 : f32
    %68 = vector.broadcast %cst_22 : f32 to vector<2x128xf32>
    %69 = arith.addf %68, %67 : vector<2x128xf32>
    %70 = arith.divf %68, %69 : vector<2x128xf32>
    %71 = math.tanh %65 : vector<2x128xf32>
    %72 = vector.extract_strided_slice %70 {offsets = [0, 0], sizes = [2, 32], strides = [1, 1]} : vector<2x128xf32> to vector<2x32xf32>
    %73 = vector.extract_strided_slice %70 {offsets = [0, 32], sizes = [2, 32], strides = [1, 1]} : vector<2x128xf32> to vector<2x32xf32>
    %74 = vector.extract_strided_slice %71 {offsets = [0, 64], sizes = [2, 32], strides = [1, 1]} : vector<2x128xf32> to vector<2x32xf32>
    %75 = vector.extract_strided_slice %70 {offsets = [0, 96], sizes = [2, 32], strides = [1, 1]} : vector<2x128xf32> to vector<2x32xf32>
    %76 = arith.mulf %73, %38 : vector<2x32xf32>
    %77 = arith.mulf %72, %74 : vector<2x32xf32>
    %78 = arith.addf %76, %77 : vector<2x32xf32>
    %79 = math.tanh %78 : vector<2x32xf32>
    %80 = arith.mulf %75, %79 : vector<2x32xf32>
    %81 = arith.truncf %80 : vector<2x32xf32> to vector<2x32xbf16>
    %cst_23 = arith.constant dense<0.000000e+00> : vector<2x64xf32>
    %82 = tpu.matmul %81, %2, %cst_23 {dimension_numbers = #tpu.dot_dimension_numbers<[1], [0], [0], [1], [0, 0, 1, 1], [], []>} : vector<2x32xbf16>, vector<32x64xbf16>, vector<2x64xf32> -> vector<2x64xf32>
    %83 = arith.addf %82, %61 : vector<2x64xf32>
    %84 = arith.addf %83, %10 : vector<2x64xf32>
    %85 = arith.negf %84 : vector<2x64xf32>
    %86 = math.exp %85 : vector<2x64xf32>
    %cst_24 = arith.constant 1.000000e+00 : f32
    %87 = vector.broadcast %cst_24 : f32 to vector<2x64xf32>
    %88 = arith.addf %87, %86 : vector<2x64xf32>
    %89 = arith.divf %87, %88 : vector<2x64xf32>
    %90 = math.tanh %84 : vector<2x64xf32>
    %91 = vector.extract_strided_slice %89 {offsets = [0, 0], sizes = [2, 16], strides = [1, 1]} : vector<2x64xf32> to vector<2x16xf32>
    %92 = vector.extract_strided_slice %89 {offsets = [0, 16], sizes = [2, 16], strides = [1, 1]} : vector<2x64xf32> to vector<2x16xf32>
    %93 = vector.extract_strided_slice %90 {offsets = [0, 32], sizes = [2, 16], strides = [1, 1]} : vector<2x64xf32> to vector<2x16xf32>
    %94 = vector.extract_strided_slice %89 {offsets = [0, 48], sizes = [2, 16], strides = [1, 1]} : vector<2x64xf32> to vector<2x16xf32>
    %95 = arith.mulf %92, %57 : vector<2x16xf32>
    %96 = arith.mulf %91, %93 : vector<2x16xf32>
    %97 = arith.addf %95, %96 : vector<2x16xf32>
    %98 = math.tanh %97 : vector<2x16xf32>
    %99 = arith.mulf %94, %98 : vector<2x16xf32>
    %100 = arith.truncf %99 : vector<2x16xf32> to vector<2x16xbf16>
    %cst_25 = arith.constant dense<0.000000e+00> : vector<2x64xf32>
    %101 = tpu.matmul %100, %3, %cst_25 {dimension_numbers = #tpu.dot_dimension_numbers<[1], [0], [0], [1], [0, 0, 1, 1], [], []>} : vector<2x16xbf16>, vector<16x64xbf16>, vector<2x64xf32> -> vector<2x64xf32>
    %102 = vector.extract_strided_slice %15 {offsets = [4, 0], sizes = [2, 128], strides = [1, 1]} : vector<16x128xf32> to vector<2x128xf32>
    %103 = arith.truncf %80 : vector<2x32xf32> to vector<2x32xbf16>
    %cst_26 = arith.constant dense<0.000000e+00> : vector<2x128xf32>
    %104 = tpu.matmul %103, %1, %cst_26 {dimension_numbers = #tpu.dot_dimension_numbers<[1], [0], [0], [1], [0, 0, 1, 1], [], []>} : vector<2x32xbf16>, vector<32x128xbf16>, vector<2x128xf32> -> vector<2x128xf32>
    %105 = arith.addf %102, %104 : vector<2x128xf32>
    %106 = arith.negf %105 : vector<2x128xf32>
    %107 = math.exp %106 : vector<2x128xf32>
    %cst_27 = arith.constant 1.000000e+00 : f32
    %108 = vector.broadcast %cst_27 : f32 to vector<2x128xf32>
    %109 = arith.addf %108, %107 : vector<2x128xf32>
    %110 = arith.divf %108, %109 : vector<2x128xf32>
    %111 = math.tanh %105 : vector<2x128xf32>
    %112 = vector.extract_strided_slice %110 {offsets = [0, 0], sizes = [2, 32], strides = [1, 1]} : vector<2x128xf32> to vector<2x32xf32>
    %113 = vector.extract_strided_slice %110 {offsets = [0, 32], sizes = [2, 32], strides = [1, 1]} : vector<2x128xf32> to vector<2x32xf32>
    %114 = vector.extract_strided_slice %111 {offsets = [0, 64], sizes = [2, 32], strides = [1, 1]} : vector<2x128xf32> to vector<2x32xf32>
    %115 = vector.extract_strided_slice %110 {offsets = [0, 96], sizes = [2, 32], strides = [1, 1]} : vector<2x128xf32> to vector<2x32xf32>
    %116 = arith.mulf %113, %78 : vector<2x32xf32>
    %117 = arith.mulf %112, %114 : vector<2x32xf32>
    %118 = arith.addf %116, %117 : vector<2x32xf32>
    %119 = math.tanh %118 : vector<2x32xf32>
    %120 = arith.mulf %115, %119 : vector<2x32xf32>
    %121 = arith.truncf %120 : vector<2x32xf32> to vector<2x32xbf16>
    %cst_28 = arith.constant dense<0.000000e+00> : vector<2x64xf32>
    %122 = tpu.matmul %121, %2, %cst_28 {dimension_numbers = #tpu.dot_dimension_numbers<[1], [0], [0], [1], [0, 0, 1, 1], [], []>} : vector<2x32xbf16>, vector<32x64xbf16>, vector<2x64xf32> -> vector<2x64xf32>
    %123 = arith.addf %122, %101 : vector<2x64xf32>
    %124 = arith.addf %123, %10 : vector<2x64xf32>
    %125 = arith.negf %124 : vector<2x64xf32>
    %126 = math.exp %125 : vector<2x64xf32>
    %cst_29 = arith.constant 1.000000e+00 : f32
    %127 = vector.broadcast %cst_29 : f32 to vector<2x64xf32>
    %128 = arith.addf %127, %126 : vector<2x64xf32>
    %129 = arith.divf %127, %128 : vector<2x64xf32>
    %130 = math.tanh %124 : vector<2x64xf32>
    %131 = vector.extract_strided_slice %129 {offsets = [0, 0], sizes = [2, 16], strides = [1, 1]} : vector<2x64xf32> to vector<2x16xf32>
    %132 = vector.extract_strided_slice %129 {offsets = [0, 16], sizes = [2, 16], strides = [1, 1]} : vector<2x64xf32> to vector<2x16xf32>
    %133 = vector.extract_strided_slice %130 {offsets = [0, 32], sizes = [2, 16], strides = [1, 1]} : vector<2x64xf32> to vector<2x16xf32>
    %134 = vector.extract_strided_slice %129 {offsets = [0, 48], sizes = [2, 16], strides = [1, 1]} : vector<2x64xf32> to vector<2x16xf32>
    %135 = arith.mulf %132, %97 : vector<2x16xf32>
    %136 = arith.mulf %131, %133 : vector<2x16xf32>
    %137 = arith.addf %135, %136 : vector<2x16xf32>
    %138 = math.tanh %137 : vector<2x16xf32>
    %139 = arith.mulf %134, %138 : vector<2x16xf32>
    %140 = arith.truncf %139 : vector<2x16xf32> to vector<2x16xbf16>
    %cst_30 = arith.constant dense<0.000000e+00> : vector<2x64xf32>
    %141 = tpu.matmul %140, %3, %cst_30 {dimension_numbers = #tpu.dot_dimension_numbers<[1], [0], [0], [1], [0, 0, 1, 1], [], []>} : vector<2x16xbf16>, vector<16x64xbf16>, vector<2x64xf32> -> vector<2x64xf32>
    %142 = vector.extract_strided_slice %15 {offsets = [6, 0], sizes = [2, 128], strides = [1, 1]} : vector<16x128xf32> to vector<2x128xf32>
    %143 = arith.truncf %120 : vector<2x32xf32> to vector<2x32xbf16>
    %cst_31 = arith.constant dense<0.000000e+00> : vector<2x128xf32>
    %144 = tpu.matmul %143, %1, %cst_31 {dimension_numbers = #tpu.dot_dimension_numbers<[1], [0], [0], [1], [0, 0, 1, 1], [], []>} : vector<2x32xbf16>, vector<32x128xbf16>, vector<2x128xf32> -> vector<2x128xf32>
    %145 = arith.addf %142, %144 : vector<2x128xf32>
    %146 = arith.negf %145 : vector<2x128xf32>
    %147 = math.exp %146 : vector<2x128xf32>
    %cst_32 = arith.constant 1.000000e+00 : f32
    %148 = vector.broadcast %cst_32 : f32 to vector<2x128xf32>
    %149 = arith.addf %148, %147 : vector<2x128xf32>
    %150 = arith.divf %148, %149 : vector<2x128xf32>
    %151 = math.tanh %145 : vector<2x128xf32>
    %152 = vector.extract_strided_slice %150 {offsets = [0, 0], sizes = [2, 32], strides = [1, 1]} : vector<2x128xf32> to vector<2x32xf32>
    %153 = vector.extract_strided_slice %150 {offsets = [0, 32], sizes = [2, 32], strides = [1, 1]} : vector<2x128xf32> to vector<2x32xf32>
    %154 = vector.extract_strided_slice %151 {offsets = [0, 64], sizes = [2, 32], strides = [1, 1]} : vector<2x128xf32> to vector<2x32xf32>
    %155 = vector.extract_strided_slice %150 {offsets = [0, 96], sizes = [2, 32], strides = [1, 1]} : vector<2x128xf32> to vector<2x32xf32>
    %156 = arith.mulf %153, %118 : vector<2x32xf32>
    %157 = arith.mulf %152, %154 : vector<2x32xf32>
    %158 = arith.addf %156, %157 : vector<2x32xf32>
    %159 = math.tanh %158 : vector<2x32xf32>
    %160 = arith.mulf %155, %159 : vector<2x32xf32>
    %161 = arith.truncf %160 : vector<2x32xf32> to vector<2x32xbf16>
    %cst_33 = arith.constant dense<0.000000e+00> : vector<2x64xf32>
    %162 = tpu.matmul %161, %2, %cst_33 {dimension_numbers = #tpu.dot_dimension_numbers<[1], [0], [0], [1], [0, 0, 1, 1], [], []>} : vector<2x32xbf16>, vector<32x64xbf16>, vector<2x64xf32> -> vector<2x64xf32>
    %163 = arith.addf %162, %141 : vector<2x64xf32>
    %164 = arith.addf %163, %10 : vector<2x64xf32>
    %165 = arith.negf %164 : vector<2x64xf32>
    %166 = math.exp %165 : vector<2x64xf32>
    %cst_34 = arith.constant 1.000000e+00 : f32
    %167 = vector.broadcast %cst_34 : f32 to vector<2x64xf32>
    %168 = arith.addf %167, %166 : vector<2x64xf32>
    %169 = arith.divf %167, %168 : vector<2x64xf32>
    %170 = math.tanh %164 : vector<2x64xf32>
    %171 = vector.extract_strided_slice %169 {offsets = [0, 0], sizes = [2, 16], strides = [1, 1]} : vector<2x64xf32> to vector<2x16xf32>
    %172 = vector.extract_strided_slice %169 {offsets = [0, 16], sizes = [2, 16], strides = [1, 1]} : vector<2x64xf32> to vector<2x16xf32>
    %173 = vector.extract_strided_slice %170 {offsets = [0, 32], sizes = [2, 16], strides = [1, 1]} : vector<2x64xf32> to vector<2x16xf32>
    %174 = vector.extract_strided_slice %169 {offsets = [0, 48], sizes = [2, 16], strides = [1, 1]} : vector<2x64xf32> to vector<2x16xf32>
    %175 = arith.mulf %172, %137 : vector<2x16xf32>
    %176 = arith.mulf %171, %173 : vector<2x16xf32>
    %177 = arith.addf %175, %176 : vector<2x16xf32>
    %178 = math.tanh %177 : vector<2x16xf32>
    %179 = arith.mulf %174, %178 : vector<2x16xf32>
    %180 = arith.truncf %179 : vector<2x16xf32> to vector<2x16xbf16>
    %cst_35 = arith.constant dense<0.000000e+00> : vector<2x64xf32>
    %181 = tpu.matmul %180, %3, %cst_35 {dimension_numbers = #tpu.dot_dimension_numbers<[1], [0], [0], [1], [0, 0, 1, 1], [], []>} : vector<2x16xbf16>, vector<16x64xbf16>, vector<2x64xf32> -> vector<2x64xf32>
    %182 = vector.extract_strided_slice %15 {offsets = [8, 0], sizes = [2, 128], strides = [1, 1]} : vector<16x128xf32> to vector<2x128xf32>
    %183 = arith.truncf %160 : vector<2x32xf32> to vector<2x32xbf16>
    %cst_36 = arith.constant dense<0.000000e+00> : vector<2x128xf32>
    %184 = tpu.matmul %183, %1, %cst_36 {dimension_numbers = #tpu.dot_dimension_numbers<[1], [0], [0], [1], [0, 0, 1, 1], [], []>} : vector<2x32xbf16>, vector<32x128xbf16>, vector<2x128xf32> -> vector<2x128xf32>
    %185 = arith.addf %182, %184 : vector<2x128xf32>
    %186 = arith.negf %185 : vector<2x128xf32>
    %187 = math.exp %186 : vector<2x128xf32>
    %cst_37 = arith.constant 1.000000e+00 : f32
    %188 = vector.broadcast %cst_37 : f32 to vector<2x128xf32>
    %189 = arith.addf %188, %187 : vector<2x128xf32>
    %190 = arith.divf %188, %189 : vector<2x128xf32>
    %191 = math.tanh %185 : vector<2x128xf32>
    %192 = vector.extract_strided_slice %190 {offsets = [0, 0], sizes = [2, 32], strides = [1, 1]} : vector<2x128xf32> to vector<2x32xf32>
    %193 = vector.extract_strided_slice %190 {offsets = [0, 32], sizes = [2, 32], strides = [1, 1]} : vector<2x128xf32> to vector<2x32xf32>
    %194 = vector.extract_strided_slice %191 {offsets = [0, 64], sizes = [2, 32], strides = [1, 1]} : vector<2x128xf32> to vector<2x32xf32>
    %195 = vector.extract_strided_slice %190 {offsets = [0, 96], sizes = [2, 32], strides = [1, 1]} : vector<2x128xf32> to vector<2x32xf32>
    %196 = arith.mulf %193, %158 : vector<2x32xf32>
    %197 = arith.mulf %192, %194 : vector<2x32xf32>
    %198 = arith.addf %196, %197 : vector<2x32xf32>
    %199 = math.tanh %198 : vector<2x32xf32>
    %200 = arith.mulf %195, %199 : vector<2x32xf32>
    %201 = arith.truncf %200 : vector<2x32xf32> to vector<2x32xbf16>
    %cst_38 = arith.constant dense<0.000000e+00> : vector<2x64xf32>
    %202 = tpu.matmul %201, %2, %cst_38 {dimension_numbers = #tpu.dot_dimension_numbers<[1], [0], [0], [1], [0, 0, 1, 1], [], []>} : vector<2x32xbf16>, vector<32x64xbf16>, vector<2x64xf32> -> vector<2x64xf32>
    %203 = arith.addf %202, %181 : vector<2x64xf32>
    %204 = arith.addf %203, %10 : vector<2x64xf32>
    %205 = arith.negf %204 : vector<2x64xf32>
    %206 = math.exp %205 : vector<2x64xf32>
    %cst_39 = arith.constant 1.000000e+00 : f32
    %207 = vector.broadcast %cst_39 : f32 to vector<2x64xf32>
    %208 = arith.addf %207, %206 : vector<2x64xf32>
    %209 = arith.divf %207, %208 : vector<2x64xf32>
    %210 = math.tanh %204 : vector<2x64xf32>
    %211 = vector.extract_strided_slice %209 {offsets = [0, 0], sizes = [2, 16], strides = [1, 1]} : vector<2x64xf32> to vector<2x16xf32>
    %212 = vector.extract_strided_slice %209 {offsets = [0, 16], sizes = [2, 16], strides = [1, 1]} : vector<2x64xf32> to vector<2x16xf32>
    %213 = vector.extract_strided_slice %210 {offsets = [0, 32], sizes = [2, 16], strides = [1, 1]} : vector<2x64xf32> to vector<2x16xf32>
    %214 = vector.extract_strided_slice %209 {offsets = [0, 48], sizes = [2, 16], strides = [1, 1]} : vector<2x64xf32> to vector<2x16xf32>
    %215 = arith.mulf %212, %177 : vector<2x16xf32>
    %216 = arith.mulf %211, %213 : vector<2x16xf32>
    %217 = arith.addf %215, %216 : vector<2x16xf32>
    %218 = math.tanh %217 : vector<2x16xf32>
    %219 = arith.mulf %214, %218 : vector<2x16xf32>
    %220 = arith.truncf %219 : vector<2x16xf32> to vector<2x16xbf16>
    %cst_40 = arith.constant dense<0.000000e+00> : vector<2x64xf32>
    %221 = tpu.matmul %220, %3, %cst_40 {dimension_numbers = #tpu.dot_dimension_numbers<[1], [0], [0], [1], [0, 0, 1, 1], [], []>} : vector<2x16xbf16>, vector<16x64xbf16>, vector<2x64xf32> -> vector<2x64xf32>
    %222 = vector.extract_strided_slice %15 {offsets = [10, 0], sizes = [2, 128], strides = [1, 1]} : vector<16x128xf32> to vector<2x128xf32>
    %223 = arith.truncf %200 : vector<2x32xf32> to vector<2x32xbf16>
    %cst_41 = arith.constant dense<0.000000e+00> : vector<2x128xf32>
    %224 = tpu.matmul %223, %1, %cst_41 {dimension_numbers = #tpu.dot_dimension_numbers<[1], [0], [0], [1], [0, 0, 1, 1], [], []>} : vector<2x32xbf16>, vector<32x128xbf16>, vector<2x128xf32> -> vector<2x128xf32>
    %225 = arith.addf %222, %224 : vector<2x128xf32>
    %226 = arith.negf %225 : vector<2x128xf32>
    %227 = math.exp %226 : vector<2x128xf32>
    %cst_42 = arith.constant 1.000000e+00 : f32
    %228 = vector.broadcast %cst_42 : f32 to vector<2x128xf32>
    %229 = arith.addf %228, %227 : vector<2x128xf32>
    %230 = arith.divf %228, %229 : vector<2x128xf32>
    %231 = math.tanh %225 : vector<2x128xf32>
    %232 = vector.extract_strided_slice %230 {offsets = [0, 0], sizes = [2, 32], strides = [1, 1]} : vector<2x128xf32> to vector<2x32xf32>
    %233 = vector.extract_strided_slice %230 {offsets = [0, 32], sizes = [2, 32], strides = [1, 1]} : vector<2x128xf32> to vector<2x32xf32>
    %234 = vector.extract_strided_slice %231 {offsets = [0, 64], sizes = [2, 32], strides = [1, 1]} : vector<2x128xf32> to vector<2x32xf32>
    %235 = vector.extract_strided_slice %230 {offsets = [0, 96], sizes = [2, 32], strides = [1, 1]} : vector<2x128xf32> to vector<2x32xf32>
    %236 = arith.mulf %233, %198 : vector<2x32xf32>
    %237 = arith.mulf %232, %234 : vector<2x32xf32>
    %238 = arith.addf %236, %237 : vector<2x32xf32>
    %239 = math.tanh %238 : vector<2x32xf32>
    %240 = arith.mulf %235, %239 : vector<2x32xf32>
    %241 = arith.truncf %240 : vector<2x32xf32> to vector<2x32xbf16>
    %cst_43 = arith.constant dense<0.000000e+00> : vector<2x64xf32>
    %242 = tpu.matmul %241, %2, %cst_43 {dimension_numbers = #tpu.dot_dimension_numbers<[1], [0], [0], [1], [0, 0, 1, 1], [], []>} : vector<2x32xbf16>, vector<32x64xbf16>, vector<2x64xf32> -> vector<2x64xf32>
    %243 = arith.addf %242, %221 : vector<2x64xf32>
    %244 = arith.addf %243, %10 : vector<2x64xf32>
    %245 = arith.negf %244 : vector<2x64xf32>
    %246 = math.exp %245 : vector<2x64xf32>
    %cst_44 = arith.constant 1.000000e+00 : f32
    %247 = vector.broadcast %cst_44 : f32 to vector<2x64xf32>
    %248 = arith.addf %247, %246 : vector<2x64xf32>
    %249 = arith.divf %247, %248 : vector<2x64xf32>
    %250 = math.tanh %244 : vector<2x64xf32>
    %251 = vector.extract_strided_slice %249 {offsets = [0, 0], sizes = [2, 16], strides = [1, 1]} : vector<2x64xf32> to vector<2x16xf32>
    %252 = vector.extract_strided_slice %249 {offsets = [0, 16], sizes = [2, 16], strides = [1, 1]} : vector<2x64xf32> to vector<2x16xf32>
    %253 = vector.extract_strided_slice %250 {offsets = [0, 32], sizes = [2, 16], strides = [1, 1]} : vector<2x64xf32> to vector<2x16xf32>
    %254 = vector.extract_strided_slice %249 {offsets = [0, 48], sizes = [2, 16], strides = [1, 1]} : vector<2x64xf32> to vector<2x16xf32>
    %255 = arith.mulf %252, %217 : vector<2x16xf32>
    %256 = arith.mulf %251, %253 : vector<2x16xf32>
    %257 = arith.addf %255, %256 : vector<2x16xf32>
    %258 = math.tanh %257 : vector<2x16xf32>
    %259 = arith.mulf %254, %258 : vector<2x16xf32>
    %260 = arith.truncf %259 : vector<2x16xf32> to vector<2x16xbf16>
    %cst_45 = arith.constant dense<0.000000e+00> : vector<2x64xf32>
    %261 = tpu.matmul %260, %3, %cst_45 {dimension_numbers = #tpu.dot_dimension_numbers<[1], [0], [0], [1], [0, 0, 1, 1], [], []>} : vector<2x16xbf16>, vector<16x64xbf16>, vector<2x64xf32> -> vector<2x64xf32>
    %262 = vector.extract_strided_slice %15 {offsets = [12, 0], sizes = [2, 128], strides = [1, 1]} : vector<16x128xf32> to vector<2x128xf32>
    %263 = arith.truncf %240 : vector<2x32xf32> to vector<2x32xbf16>
    %cst_46 = arith.constant dense<0.000000e+00> : vector<2x128xf32>
    %264 = tpu.matmul %263, %1, %cst_46 {dimension_numbers = #tpu.dot_dimension_numbers<[1], [0], [0], [1], [0, 0, 1, 1], [], []>} : vector<2x32xbf16>, vector<32x128xbf16>, vector<2x128xf32> -> vector<2x128xf32>
    %265 = arith.addf %262, %264 : vector<2x128xf32>
    %266 = arith.negf %265 : vector<2x128xf32>
    %267 = math.exp %266 : vector<2x128xf32>
    %cst_47 = arith.constant 1.000000e+00 : f32
    %268 = vector.broadcast %cst_47 : f32 to vector<2x128xf32>
    %269 = arith.addf %268, %267 : vector<2x128xf32>
    %270 = arith.divf %268, %269 : vector<2x128xf32>
    %271 = math.tanh %265 : vector<2x128xf32>
    %272 = vector.extract_strided_slice %270 {offsets = [0, 0], sizes = [2, 32], strides = [1, 1]} : vector<2x128xf32> to vector<2x32xf32>
    %273 = vector.extract_strided_slice %270 {offsets = [0, 32], sizes = [2, 32], strides = [1, 1]} : vector<2x128xf32> to vector<2x32xf32>
    %274 = vector.extract_strided_slice %271 {offsets = [0, 64], sizes = [2, 32], strides = [1, 1]} : vector<2x128xf32> to vector<2x32xf32>
    %275 = vector.extract_strided_slice %270 {offsets = [0, 96], sizes = [2, 32], strides = [1, 1]} : vector<2x128xf32> to vector<2x32xf32>
    %276 = arith.mulf %273, %238 : vector<2x32xf32>
    %277 = arith.mulf %272, %274 : vector<2x32xf32>
    %278 = arith.addf %276, %277 : vector<2x32xf32>
    %279 = math.tanh %278 : vector<2x32xf32>
    %280 = arith.mulf %275, %279 : vector<2x32xf32>
    %281 = arith.truncf %280 : vector<2x32xf32> to vector<2x32xbf16>
    %cst_48 = arith.constant dense<0.000000e+00> : vector<2x64xf32>
    %282 = tpu.matmul %281, %2, %cst_48 {dimension_numbers = #tpu.dot_dimension_numbers<[1], [0], [0], [1], [0, 0, 1, 1], [], []>} : vector<2x32xbf16>, vector<32x64xbf16>, vector<2x64xf32> -> vector<2x64xf32>
    %283 = arith.addf %282, %261 : vector<2x64xf32>
    %284 = arith.addf %283, %10 : vector<2x64xf32>
    %285 = arith.negf %284 : vector<2x64xf32>
    %286 = math.exp %285 : vector<2x64xf32>
    %cst_49 = arith.constant 1.000000e+00 : f32
    %287 = vector.broadcast %cst_49 : f32 to vector<2x64xf32>
    %288 = arith.addf %287, %286 : vector<2x64xf32>
    %289 = arith.divf %287, %288 : vector<2x64xf32>
    %290 = math.tanh %284 : vector<2x64xf32>
    %291 = vector.extract_strided_slice %289 {offsets = [0, 0], sizes = [2, 16], strides = [1, 1]} : vector<2x64xf32> to vector<2x16xf32>
    %292 = vector.extract_strided_slice %289 {offsets = [0, 16], sizes = [2, 16], strides = [1, 1]} : vector<2x64xf32> to vector<2x16xf32>
    %293 = vector.extract_strided_slice %290 {offsets = [0, 32], sizes = [2, 16], strides = [1, 1]} : vector<2x64xf32> to vector<2x16xf32>
    %294 = vector.extract_strided_slice %289 {offsets = [0, 48], sizes = [2, 16], strides = [1, 1]} : vector<2x64xf32> to vector<2x16xf32>
    %295 = arith.mulf %292, %257 : vector<2x16xf32>
    %296 = arith.mulf %291, %293 : vector<2x16xf32>
    %297 = arith.addf %295, %296 : vector<2x16xf32>
    %298 = math.tanh %297 : vector<2x16xf32>
    %299 = arith.mulf %294, %298 : vector<2x16xf32>
    %300 = arith.truncf %299 : vector<2x16xf32> to vector<2x16xbf16>
    %cst_50 = arith.constant dense<0.000000e+00> : vector<2x64xf32>
    %301 = tpu.matmul %300, %3, %cst_50 {dimension_numbers = #tpu.dot_dimension_numbers<[1], [0], [0], [1], [0, 0, 1, 1], [], []>} : vector<2x16xbf16>, vector<16x64xbf16>, vector<2x64xf32> -> vector<2x64xf32>
    %302 = vector.extract_strided_slice %15 {offsets = [14, 0], sizes = [2, 128], strides = [1, 1]} : vector<16x128xf32> to vector<2x128xf32>
    %303 = arith.truncf %280 : vector<2x32xf32> to vector<2x32xbf16>
    %cst_51 = arith.constant dense<0.000000e+00> : vector<2x128xf32>
    %304 = tpu.matmul %303, %1, %cst_51 {dimension_numbers = #tpu.dot_dimension_numbers<[1], [0], [0], [1], [0, 0, 1, 1], [], []>} : vector<2x32xbf16>, vector<32x128xbf16>, vector<2x128xf32> -> vector<2x128xf32>
    %305 = arith.addf %302, %304 : vector<2x128xf32>
    %306 = arith.negf %305 : vector<2x128xf32>
    %307 = math.exp %306 : vector<2x128xf32>
    %cst_52 = arith.constant 1.000000e+00 : f32
    %308 = vector.broadcast %cst_52 : f32 to vector<2x128xf32>
    %309 = arith.addf %308, %307 : vector<2x128xf32>
    %310 = arith.divf %308, %309 : vector<2x128xf32>
    %311 = math.tanh %305 : vector<2x128xf32>
    %312 = vector.extract_strided_slice %310 {offsets = [0, 0], sizes = [2, 32], strides = [1, 1]} : vector<2x128xf32> to vector<2x32xf32>
    %313 = vector.extract_strided_slice %310 {offsets = [0, 32], sizes = [2, 32], strides = [1, 1]} : vector<2x128xf32> to vector<2x32xf32>
    %314 = vector.extract_strided_slice %311 {offsets = [0, 64], sizes = [2, 32], strides = [1, 1]} : vector<2x128xf32> to vector<2x32xf32>
    %315 = vector.extract_strided_slice %310 {offsets = [0, 96], sizes = [2, 32], strides = [1, 1]} : vector<2x128xf32> to vector<2x32xf32>
    %316 = arith.mulf %313, %278 : vector<2x32xf32>
    %317 = arith.mulf %312, %314 : vector<2x32xf32>
    %318 = arith.addf %316, %317 : vector<2x32xf32>
    %319 = math.tanh %318 : vector<2x32xf32>
    %320 = arith.mulf %315, %319 : vector<2x32xf32>
    %321 = arith.truncf %320 : vector<2x32xf32> to vector<2x32xbf16>
    %cst_53 = arith.constant dense<0.000000e+00> : vector<2x64xf32>
    %322 = tpu.matmul %321, %2, %cst_53 {dimension_numbers = #tpu.dot_dimension_numbers<[1], [0], [0], [1], [0, 0, 1, 1], [], []>} : vector<2x32xbf16>, vector<32x64xbf16>, vector<2x64xf32> -> vector<2x64xf32>
    %323 = arith.addf %322, %301 : vector<2x64xf32>
    %324 = arith.addf %323, %10 : vector<2x64xf32>
    %325 = arith.negf %324 : vector<2x64xf32>
    %326 = math.exp %325 : vector<2x64xf32>
    %cst_54 = arith.constant 1.000000e+00 : f32
    %327 = vector.broadcast %cst_54 : f32 to vector<2x64xf32>
    %328 = arith.addf %327, %326 : vector<2x64xf32>
    %329 = arith.divf %327, %328 : vector<2x64xf32>
    %330 = math.tanh %324 : vector<2x64xf32>
    %331 = vector.extract_strided_slice %329 {offsets = [0, 0], sizes = [2, 16], strides = [1, 1]} : vector<2x64xf32> to vector<2x16xf32>
    %332 = vector.extract_strided_slice %329 {offsets = [0, 16], sizes = [2, 16], strides = [1, 1]} : vector<2x64xf32> to vector<2x16xf32>
    %333 = vector.extract_strided_slice %330 {offsets = [0, 32], sizes = [2, 16], strides = [1, 1]} : vector<2x64xf32> to vector<2x16xf32>
    %334 = vector.extract_strided_slice %329 {offsets = [0, 48], sizes = [2, 16], strides = [1, 1]} : vector<2x64xf32> to vector<2x16xf32>
    %335 = arith.mulf %332, %297 : vector<2x16xf32>
    %336 = arith.mulf %331, %333 : vector<2x16xf32>
    %337 = arith.addf %335, %336 : vector<2x16xf32>
    %338 = math.tanh %337 : vector<2x16xf32>
    %339 = arith.mulf %334, %338 : vector<2x16xf32>
    %340 = tpu.concatenate %59, %99, %139, %179, %219, %259, %299, %339 in 0 : vector<2x16xf32>, vector<2x16xf32>, vector<2x16xf32>, vector<2x16xf32>, vector<2x16xf32>, vector<2x16xf32>, vector<2x16xf32>, vector<2x16xf32> -> vector<16x16xf32>
    %c0_55 = arith.constant 0 : index
    %c0_56 = arith.constant 0 : index
    %341 = vector.load %arg5[%c0_55, %c0_56] : memref<16x16xf32, #tpu.memory_space<vmem>>, vector<16x16xf32>
    %cst_57 = arith.constant dense<0.000000e+00> : vector<16x16xf32>
    %342 = tpu.matmul %340, %341, %cst_57 {dimension_numbers = #tpu.dot_dimension_numbers<[1], [0], [0], [1], [0, 0, 1, 1], [], []>} : vector<16x16xf32>, vector<16x16xf32>, vector<16x16xf32> -> vector<16x16xf32>
    %343 = vector.broadcast %7 : vector<1x16xf32> to vector<16x16xf32>
    %344 = arith.addf %342, %343 : vector<16x16xf32>
    %cst_58 = arith.constant 0.000000e+00 : f32
    %345 = vector.broadcast %cst_58 : f32 to vector<16x16xf32>
    %346 = arith.maximumf %344, %345 : vector<16x16xf32>
    %c0_59 = arith.constant 0 : index
    %c0_60 = arith.constant 0 : index
    %347 = vector.load %arg6[%c0_59, %c0_60] : memref<16x128xf32, #tpu.memory_space<vmem>>, vector<16x128xf32>
    %cst_61 = arith.constant dense<0.000000e+00> : vector<16x128xf32>
    %348 = tpu.matmul %346, %347, %cst_61 {dimension_numbers = #tpu.dot_dimension_numbers<[1], [0], [0], [1], [0, 0, 1, 1], [], []>} : vector<16x16xf32>, vector<16x128xf32>, vector<16x128xf32> -> vector<16x128xf32>
    %349 = vector.broadcast %8 : vector<1x128xf32> to vector<16x128xf32>
    %350 = arith.addf %348, %349 : vector<16x128xf32>
    %c0_62 = arith.constant 0 : index
    %c0_63 = arith.constant 0 : index
    %351 = vector.load %arg8[%c0_62, %c0_63] : memref<16x128xf32, #tpu.memory_space<vmem>>, vector<16x128xf32>
    tpu.vector_store %arg8[%c0_62, %c0_63], %350 {strides = array<i32>} : memref<16x128xf32, #tpu.memory_space<vmem>>, vector<16x128xf32>,
    return
  }
}

</mosaic_0001>

<bundles_post_ra>
// kernel: tpu_custom_call.1
= control target key start
LH: loop header
LB: loop body
LE: loop exit
PB: predicated region body
PF: predicated region fallthrough
CT: control target
= control target key end

     0   :  { %13 = vsyncpa [#allocation3], 0  ;;  %s2969_s0 = inlined_call_operand.vmem [shape: f32[16,2], index: 0, kind: input, shape index: {}]   ;;  %s2970_s1 = inlined_call_operand.hbm [shape: bf16[2,128], index: 1, kind: input, shape index: {}]   ;;  %s2971_s2 = inlined_call_operand.vmem [shape: bf16[32,128], index: 2, kind: input, shape index: {}]   ;;  %s2972_s3 = inlined_call_operand.hbm [shape: bf16[32,64], index: 3, kind: input, shape index: {}]   ;;  %s2973_s4 = inlined_call_operand.vmem [shape: bf16[16,64], index: 4, kind: input, shape index: {}]   ;;  %s2974_s5 = inlined_call_operand.hbm [shape: f32[16,16], index: 5, kind: input, shape index: {}]   ;;  %s2975_s6 = inlined_call_operand.hbm [shape: f32[16,128], index: 6, kind: input, shape index: {}]   ;;  %s2976_s7 = inlined_call_operand.vmem [shape: f32[4,128], index: 7, kind: input, shape index: {}]   ;;  %s2977_s8 = inlined_call_operand.hbm [shape: f32[16,128], index: 8, kind: output, shape index: {}]  }
   0x1   :  { %14 = vsyncpa [#allocation6], 0 }
   0x2   :  { %15 = vsyncpa [#allocation9], 0 }
   0x3   :  { %16 = vsyncpa [#allocation4], 0  ;;  %s2511_s27 = smov [#allocation5]  }
   0x4   :  { %s36_s28 = sshll.u32 %s2511_s27, 4  ;;  %s37_s28 = int_to_ptr.vmem [resolvable:$true] %s36_s28 }
   0x5   :  { %s2411_s29 = scalar_lea.vmem %s37_s28, 256  ;;  %p2416_p1 = scmp.lt.s32.totalorder %s37_s28, %s37_s28 }
   0x6   :  { %p2412_p0 = scmp.ne.s32.totalorder %s37_s28, %s2411_s29  ;;  %p2417_p2 = scmp.lt.s32.totalorder %s2411_s29, %s2411_s29 }
   0x8   :  { %p2418_p3 = por %p2417_p2, %p2416_p1 }
   0xa   :  { %p2419_p4 = pnand %p2418_p3, %p2412_p0 }
   0xc   :  { %2422 = shalt.err (!%p2419_p4)
}
   0xd   :  { %s2512_s30 = smov 64   ;;  %s2513_s9 = smov 4  }
   0xe   :  { %42 = dma.hbm_to_vmem [thread:$0]  %s2972_s3, 256, %s37_s28, [#allocation6], %s2512_s30, %s2512_s30, %s2513_s9  }
   0xf   :  { %s2514_s12 = smov [#allocation2]   ;;  %s2515_s14 = smov [#allocation7]  }
  0x10   :  { %s25_s13 = sshll.u32 %s2514_s12, 4  ;;  %s50_s15 = sshll.u32 %s2515_s14, 4  ;;  %s26_s13 = int_to_ptr.vmem [resolvable:$true] %s25_s13  ;;  %s51_s15 = int_to_ptr.vmem [resolvable:$true] %s50_s15 }
  0x11   :  { %s2431_s16 = scalar_lea.vmem %s26_s13, 16  ;;  %s2435_s17 = scalar_lea.vmem %s26_s13, 32 }
  0x12   :  { %p2432_p5 = scmp.ne.s32.totalorder %s26_s13, %s2431_s16  ;;  %p2436_p6 = scmp.lt.s32.totalorder %s26_s13, %s26_s13 }
  0x13   :  { %p2437_p7 = scmp.lt.s32.totalorder %s2435_s17, %s2431_s16 }
  0x15   :  { %p2438_p8 = por %p2437_p7, %p2436_p6 }
  0x17   :  { %p2439_p9 = pnand %p2438_p8, %p2432_p5 }
  0x19   :  { %2442 = shalt.err (!%p2439_p9)
}
  0x1a   :  { %28 = dma.hbm_to_vmem [thread:$0]  %s2970_s1, 16, %s26_s13, [#allocation3]  }
  0x1b   :  { %s2451_s20 = scalar_lea.vmem %s51_s15, 256  ;;  %p2456_p11 = scmp.lt.s32.totalorder %s51_s15, %s51_s15 }
  0x1c   :  { %p2452_p10 = scmp.ne.s32.totalorder %s51_s15, %s2451_s20  ;;  %p2457_p12 = scmp.lt.s32.totalorder %s2451_s20, %s2451_s20 }
  0x1e   :  { %p2458_p13 = por %p2457_p12, %p2456_p11 }
  0x20   :  { %p2459_p0 = pnand %p2458_p13, %p2452_p10 }
  0x22   :  { %2462 = shalt.err (!%p2459_p0)
}
  0x23   :  { %s2516_s3 = smov 128   ;;  %s2517_s21 = smov 8  }
  0x24   :  { %56 = dma.hbm_to_vmem [thread:$0]  %s2974_s5, 256, %s51_s15, [#allocation6], %s2516_s3, %s2516_s3, %s2517_s21  }
  0x25   :  { %s2518_s24 = smov [#allocation8]  }
  0x26   :  { %s62_s25 = sshll.u32 %s2518_s24, 4  ;;  %s63_s25 = int_to_ptr.vmem [resolvable:$true] %s62_s25 }
  0x27   :  { %s2471_s1 = scalar_lea.vmem %s63_s25, 256  ;;  %p2476_p2 = scmp.lt.s32.totalorder %s63_s25, %s63_s25 }
  0x28   :  { %p2472_p1 = scmp.ne.s32.totalorder %s63_s25, %s2471_s1  ;;  %p2477_p3 = scmp.lt.s32.totalorder %s2471_s1, %s2471_s1 }
  0x2a   :  { %p2478_p4 = por %p2477_p3, %p2476_p2 }
  0x2c   :  { %p2479_p5 = pnand %p2478_p4, %p2472_p1 }
  0x2e   :  { %2482 = shalt.err (!%p2479_p5)
}
  0x2f   :  { %68 = dma.hbm_to_vmem [thread:$0]  %s2975_s6, 256, %s63_s25, [#allocation9], %s2516_s3, %s2516_s3, %s2517_s21  }
  0x30   :  { %2503 = dma.done.wait [#allocation3], 16  }
  0x31   :  { %2504 = vsyncadd [#allocation3], 4294967280 }
  0x32   :  { %2505 = dma.done.wait [#allocation6], 512  }
  0x33   :  { %2506 = vsyncadd [#allocation6], 4294966784 }
  0x34   :  { %2507 = dma.done.wait [#allocation9], 256  }
  0x35   :  { %2508 = vsyncadd [#allocation9], 4294967040  ;;  %v2519_v0 = vmov 0.0   ;;  %vm2520_vm0 = vmmov 0   ;;  %vm111_vm1 = vcmask 1040384   ;;  %v100_v2 = vld [vmem:[%s2969_s0] sm:$0xff]  ;;  %v96_v9 = vlaneseq }
  0x36   :  { %2053 = vmatprep.subr.bf16.mxu0 %v2519_v0  ;;  %2055 = vmatprep.mubr.msk.bf16.mxu0 %vm2520_vm0, %v2519_v0  ;;  %v84_v1 = vld [vmem:[#allocation2] sm:$0x1]  ;;  %v101_v3 = vld [vmem:[%s2969_s0 + $0x8] sm:$0xff]  ;;  %vm107_vm2 = vcmask 15360   ;;  %v2521_v8 = vmov 0   ;;  %s2522_s14 = smov 32  }
  0x37   :  { %2059 = vmatprep.subr.bf16.mxu1 %v2519_v0  ;;  %2061 = vmatprep.mubr.msk.bf16.mxu1 %vm2520_vm0, %v2519_v0  ;;  %v113_v4 = vsel %vm111_vm1, %v84_v1, 0  ;;  %v102_v5 = vpack.c.bf16 %v101_v3, %v100_v2  ;;  %v2607_v6 = vld [vmem:[%s2971_s2 + $0x8] sm:$0xff]   ;;  %v2614_v7 = vld [vmem:[%s2971_s2] sm:$0xff]   ;;  %v2623_v10 = vshrl.u32 %v96_v9, 7  ;;  %vm218_vm3 = vcmask 261120   ;;  %s2524_s17 = smov 16  }
  0x38   :  { %2054 = vmatpush3.bf16.msra.mxu0 %v113_v4  ;;  %v2629_v12 = vld [vmem:[%s2976_s7] sm:$0xf]  ;;  %v2648_v36 = vld [vmem:[#allocation5 + $0x8] sm:$0xff]   ;;  %s2525_s18 = smov 80   ;;  %vm162_vm4 = vcmask 130048   ;;  %vm1721_vm5 = vcmask 1041408  }
  0x39   :  { %2065 = vmatprep.subr.bf16.mxu0 %v2519_v0  ;;  %v105_v11 = vsub.s32 0, %v2623_v10  ;;  %v2645_v35 = vld [vmem:[%s2973_s4] sm:$0xff]   ;;  %v98_v47 = vsub.s32 1, %v2623_v10  ;;  %s2523_s4 = smov 96   ;;  %vm1723_vm6 = vcmask 1043456   ;;  %vm1725_vm7 = vcmask 1045504  }
  0x3a   :  { %2060 = vmatpush3.bf16.msra.mxu1 %v2645_v35  ;;  %v2654_v37 = vld [vmem:[#allocation5] sm:$0xff]   ;;  %s2526_s24 = smov [#allocation10]  }
  0x3b   :  { %2056 = vmatmul.mubr.msk.bf16.vlgmr.msra.gmra.mxu0 %vm107_vm2, %v102_v5  ;;  %v106_v15 = vrot.slane %v2629_v12, %v105_v11  ;;  %2073 = vmatprep.subr.bf16.mxu1 %v2519_v0  ;;  %v2677_v48 = vrot.slane %v2629_v12, %v98_v47  ;;  %s1917_s25 = sshll.u32 %s2526_s24, 4  ;;  %s1918_s25 = int_to_ptr.vmem [resolvable:$true] %s1917_s25 }
  0x3c   :  { %2066 = vmatpush3.bf16.msra.mxu0 %v2607_v6  ;;  %2069 = vmatprep.mubr.msk.bf16.mxu0 %vm2520_vm0, %v2519_v0  ;;  %p2488_p7 = scmp.lt.s32.totalorder %s1918_s25, %s1918_s25 }
  0x3d   :  { %2067 = vmatprep.subr.bf16.mxu0 %v2519_v0  ;;  %2062 = vmatmul.mubr.bf16.vlgmr.msra.gmra.mxu1 %v2521_v8 }
  0x3e   :  { %2074 = vmatpush3.bf16.msra.mxu1 %v2648_v36  ;;  %2077 = vmatprep.mubr.msk.bf16.mxu1 %vm2520_vm0, %v2519_v0 }
  0x3f   :  { %2075 = vmatprep.subr.bf16.mxu1 %v2519_v0 }
  0x40   :  { %2068 = vmatpush3.bf16.msra.mxu0 %v2614_v7 }
  0x41   :  { %2081 = vmatprep.subr.bf16.mxu0 %v2519_v0 }
  0x42   :  { %2076 = vmatpush3.bf16.msra.mxu1 %v2654_v37 }
  0x43   :  { %2070 = vmatmul.mubr.bf16.vlgmr.msra.gmra.mxu0 %v2521_v8  ;;  %2087 = vmatprep.subr.bf16.mxu1 %v2519_v0 }
  0x44   :  { %2083 = vmatprep.mubr.msk.bf16.mxu0 %vm2520_vm0, %v2519_v0  ;;  %2082 = vmatpush3.bf16.msra.mxu0 %v2645_v35 }
  0x45   :  { %2095 = vmatprep.subr.bf16.mxu0 %v2519_v0 }
  0xfb   :  { %v149_v13 = vpop.f32.mrf.mxu0 }
  0xfc   :  { %v2634_v19 = vadd.f32 %v149_v13, %v106_v15 }
  0xfd   :  { %v2057_v14 = vpop.f32.mrf.mxu0  ;;  %v200_v42 = vpop.f32.mrf.mxu1 }
  0xff   :  { %v152_v16 = vpop.f32.mrf.mxu0  ;;  %v2063_v43 = vpop.f32.mrf.mxu1 }
 0x100   :  { %v2632_v17 = vadd.f32 %v152_v16, %v106_v15 }
 0x101   :  { %v2058_v18 = vpop.f32.mrf.mxu0  ;;  %v203_v44 = vpop.f32.mrf.mxu1 }
 0x103   :  { %v255_v20 = vpop.f32.mrf.mxu0  ;;  %v2064_v45 = vpop.f32.mrf.mxu1 }
 0x104   :  { %v261_v21 = vadd.f32 %v255_v20, %v2634_v19 }
 0x105   :  { %v2071_v22 = vpop.f32.mrf.mxu0 }
 0x106   :  { %2270 = vtanh.f32 %v261_v21  ;;  %v1935_v26 = vmul.f32 -1.442695, %v261_v21 }
 0x107   :  { %v258_v23 = vpop.f32.mrf.mxu0 }
 0x108   :  { %2272 = vpow2.f32 %v1935_v26 }
 0x109   :  { %v2072_v24 = vpop.f32.mrf.mxu0 }
 0x113   :  { %v2271_v25 = vpop.eup %2270 }
 0x114   :  { %271 = vrot.lane.b32.xlu0 %v2271_v25, %s2512_s30 }
 0x115   :  { %v2273_v27 = vpop.eup %2272 }
 0x116   :  { %v265_v28 = vadd.f32 1.0, %v2273_v27 }
 0x118   :  { %2274 = vrcp.f32 %v265_v28 }
 0x125   :  { %v2275_v29 = vpop.eup %2274 }
 0x126   :  { %v269_v32 = vmul.f32 0.0, %v2275_v29 }
 0x186   :  { %v272_v30 = vpop.permute.xlu0 %271 }
 0x187   :  { %v274_v31 = vmul.f32 %v2275_v29, %v272_v30 }
 0x189   :  { %276 = vrot.lane.b32.xlu0 %v274_v31, %s2522_s14 }
 0x1fb   :  { %v277_v33 = vpop.permute.xlu0 %276 }
 0x1fc   :  { %v2639_v34 = vadd.f32 %v277_v33, %v269_v32 }
 0x1fe   :  { %2276 = vtanh.f32 %v2639_v34  ;;  %v469_v20 = vrot.slane %v2639_v34, 6 }
 0x20b   :  { %v2277_v38 = vpop.eup %2276 }
 0x20c   :  { %282 = vrot.lane.b32.xlu1 %v2277_v38, %s2512_s30 }
 0x27e   :  { %v283_v39 = vpop.permute.xlu1 %282 }
 0x27f   :  { %v285_v40 = vmul.f32 %v2275_v29, %v283_v39 }
 0x281   :  { %v286_v41 = vpack.c.bf16 %v285_v40, %v285_v40 }
 0x283   :  { %288 = vrot.lane.b32.xlu1 %v286_v41, %s2522_s14 }
 0x2f5   :  { %v289_v46 = vpop.permute.xlu1 %288 }
 0x2f6   :  { %2078 = vmatmul.mubr.msk.bf16.vlgmr.msra.gmra.mxu1 %vm218_vm3, %v289_v46 }
 0x2f7   :  { %2088 = vmatpush3.bf16.msra.mxu1 %v2607_v6  ;;  %2091 = vmatprep.mubr.msk.bf16.mxu1 %vm2520_vm0, %v2519_v0 }
 0x2f8   :  { %2089 = vmatprep.subr.bf16.mxu1 %v2519_v0 }
 0x2fb   :  { %2090 = vmatpush3.bf16.msra.mxu1 %v2614_v7 }
 0x2fc   :  { %2103 = vmatprep.subr.bf16.mxu1 %v2519_v0 }
 0x2fe   :  { %2092 = vmatmul.mubr.msk.bf16.vlgmr.msra.gmra.mxu1 %vm218_vm3, %v289_v46 }
 0x2ff   :  { %2104 = vmatpush3.bf16.msra.mxu1 %v2645_v35  ;;  %2105 = vmatprep.mubr.msk.bf16.mxu1 %vm2520_vm0, %v2519_v0 }
 0x300   :  { %2117 = vmatprep.subr.bf16.mxu1 %v2519_v0 }
 0x3b6   :  { %v339_v49 = vpop.f32.mrf.mxu1 }
 0x3b7   :  { %v340_v50 = vadd.f32 %v339_v49, %v200_v42 }
 0x3b8   :  { %v2079_v51 = vpop.f32.mrf.mxu1 }
 0x3b9   :  { %v345_v52 = vadd.f32 %v340_v50, %v2677_v48 }
 0x3ba   :  { %v342_v53 = vpop.f32.mrf.mxu1 }
 0x3bb   :  { %2278 = vtanh.f32 %v345_v52  ;;  %v1939_v63 = vmul.f32 -1.442695, %v345_v52 }
 0x3bc   :  { %v2080_v54 = vpop.f32.mrf.mxu1 }
 0x3be   :  { %v451_v55 = vpop.f32.mrf.mxu1 }
 0x3bf   :  { %v458_v56 = vrot.slane %v451_v55, 6 }
 0x3c0   :  { %v2093_v57 = vpop.f32.mrf.mxu1 }
 0x3c1   :  { %v460_v58 = vadd.f32 %v458_v56, %v2634_v19 }
 0x3c2   :  { %v454_v59 = vpop.f32.mrf.mxu1 }
 0x3c3   :  { %2280 = vtanh.f32 %v460_v58  ;;  %v1942_v1 = vmul.f32 -1.442695, %v460_v58 }
 0x3c4   :  { %v2094_v60 = vpop.f32.mrf.mxu1  ;;  %2282 = vpow2.f32 %v1939_v63 }
 0x3c5   :  { %2284 = vpow2.f32 %v1942_v1 }
 0x3c8   :  { %v2279_v61 = vpop.eup %2278 }
 0x3c9   :  { %355 = vrot.lane.b32.xlu0 %v2279_v61, %s2523_s4 }
 0x3d0   :  { %v2281_v62 = vpop.eup %2280 }
 0x3d1   :  { %473 = vrot.lane.b32.xlu1 %v2281_v62, %s2512_s30  ;;  %v2283_v2 = vpop.eup %2282 }
 0x3d2   :  { %v349_v3 = vadd.f32 1.0, %v2283_v2  ;;  %v2285_v4 = vpop.eup %2284 }
 0x3d3   :  { %v464_v5 = vadd.f32 1.0, %v2285_v4 }
 0x3d4   :  { %2286 = vrcp.f32 %v349_v3 }
 0x3d5   :  { %2288 = vrcp.f32 %v464_v5 }
 0x3e1   :  { %v2287_v8 = vpop.eup %2286 }
 0x3e2   :  { %v2289_v12 = vpop.eup %2288  ;;  %v353_v15 = vmul.f32 0.0, %v2287_v8 }
 0x3e3   :  { %v471_v21 = vmul.f32 %v2289_v12, %v469_v20 }
 0x43b   :  { %v356_v9 = vpop.permute.xlu0 %355 }
 0x43c   :  { %v358_v11 = vmul.f32 %v2287_v8, %v356_v9 }
 0x43e   :  { %360 = vrot.lane.b32.xlu0 %v358_v11, %s2524_s17 }
 0x443   :  { %v474_v13 = vpop.permute.xlu1 %473 }
 0x444   :  { %v476_v14 = vmul.f32 %v2289_v12, %v474_v13 }
 0x446   :  { %478 = vrot.lane.b32.xlu1 %v476_v14, %s2522_s14 }
 0x4b0   :  { %v361_v16 = vpop.permute.xlu0 %360 }
 0x4b1   :  { %v2685_v18 = vadd.f32 %v361_v16, %v353_v15 }
 0x4b3   :  { %2290 = vtanh.f32 %v2685_v18 }
 0x4b8   :  { %v479_v22 = vpop.permute.xlu1 %478 }
 0x4b9   :  { %v2689_v23 = vadd.f32 %v479_v22, %v471_v21 }
 0x4bb   :  { %2292 = vtanh.f32 %v2689_v23 }
 0x4c0   :  { %v2291_v24 = vpop.eup %2290 }
 0x4c1   :  { %366 = vrot.lane.b32.xlu0 %v2291_v24, %s2522_s14 }
 0x4c8   :  { %v2293_v25 = vpop.eup %2292 }
 0x4c9   :  { %484 = vrot.lane.b32.xlu1 %v2293_v25, %s2512_s30 }
 0x533   :  { %v367_v26 = vpop.permute.xlu0 %366 }
 0x534   :  { %v2694_v27 = vmul.f32 %v2287_v8, %v367_v26 }
 0x536   :  { %v370_v28 = vpack.c.bf16 %v2694_v27, %v2694_v27 }
 0x538   :  { %372 = vrot.lane.b32.xlu0 %v370_v28, %s2525_s18 }
 0x53b   :  { %v485_v29 = vpop.permute.xlu1 %484 }
 0x53c   :  { %v487_v30 = vmul.f32 %v2289_v12, %v485_v29  ;;  %v660_v12 = vrot.slane %v2689_v23, 6 }
 0x53e   :  { %v488_v31 = vpack.c.bf16 %v487_v30, %v487_v30 }
 0x540   :  { %v490_v32 = vrot.slane %v488_v31, 1 }
 0x542   :  { %491 = vrot.lane.b32.xlu1 %v490_v32, %s2522_s14 }
 0x5aa   :  { %v373_v33 = vpop.permute.xlu0 %372 }
 0x5ab   :  { %2084 = vmatmul.mubr.msk.bf16.vlgmr.msra.gmra.mxu0 %vm162_vm4, %v373_v33 }
 0x5ac   :  { %2096 = vmatpush3.bf16.msra.mxu0 %v2648_v36  ;;  %2099 = vmatprep.mubr.msk.bf16.mxu0 %vm2520_vm0, %v2519_v0 }
 0x5ad   :  { %2097 = vmatprep.subr.bf16.mxu0 %v2519_v0 }
 0x5b0   :  { %2098 = vmatpush3.bf16.msra.mxu0 %v2654_v37 }
 0x5b1   :  { %2109 = vmatprep.subr.bf16.mxu0 %v2519_v0 }
 0x5b4   :  { %v492_v34 = vpop.permute.xlu1 %491 }
 0x5b5   :  { %2100 = vmatmul.mubr.msk.bf16.vlgmr.msra.gmra.mxu0 %vm218_vm3, %v492_v34 }
 0x5b6   :  { %2110 = vmatpush3.bf16.msra.mxu0 %v2607_v6  ;;  %2113 = vmatprep.mubr.msk.bf16.mxu0 %vm2520_vm0, %v2519_v0 }
 0x5b7   :  { %2111 = vmatprep.subr.bf16.mxu0 %v2519_v0 }
 0x5ba   :  { %2112 = vmatpush3.bf16.msra.mxu0 %v2614_v7 }
 0x5bb   :  { %2125 = vmatprep.subr.bf16.mxu0 %v2519_v0 }
 0x5bd   :  { %2114 = vmatmul.mubr.msk.bf16.vlgmr.msra.gmra.mxu0 %vm218_vm3, %v492_v34 }
 0x5be   :  { %2126 = vmatpush3.bf16.msra.mxu0 %v2645_v35  ;;  %2127 = vmatprep.mubr.msk.bf16.mxu0 %vm2520_vm0, %v2519_v0 }
 0x5bf   :  { %2139 = vmatprep.subr.bf16.mxu0 %v2519_v0 }
 0x66b   :  { %v411_v38 = vpop.f32.mrf.mxu0 }
 0x66d   :  { %v2085_v39 = vpop.f32.mrf.mxu0 }
 0x66f   :  { %v414_v40 = vpop.f32.mrf.mxu0 }
 0x671   :  { %v2086_v41 = vpop.f32.mrf.mxu0 }
 0x675   :  { %v530_v42 = vpop.f32.mrf.mxu0 }
 0x676   :  { %v531_v43 = vadd.f32 %v530_v42, %v411_v38 }
 0x677   :  { %v2101_v44 = vpop.f32.mrf.mxu0 }
 0x678   :  { %v536_v45 = vadd.f32 %v531_v43, %v2677_v48 }
 0x679   :  { %v533_v46 = vpop.f32.mrf.mxu0 }
 0x67a   :  { %2294 = vtanh.f32 %v536_v45  ;;  %v1944_v57 = vmul.f32 -1.442695, %v536_v45 }
 0x67b   :  { %v2102_v47 = vpop.f32.mrf.mxu0 }
 0x67d   :  { %v642_v49 = vpop.f32.mrf.mxu0 }
 0x67e   :  { %v649_v50 = vrot.slane %v642_v49, 4 }
 0x67f   :  { %v2115_v51 = vpop.f32.mrf.mxu0 }
 0x680   :  { %v651_v52 = vadd.f32 %v649_v50, %v2634_v19 }
 0x681   :  { %v645_v53 = vpop.f32.mrf.mxu0 }
 0x682   :  { %2296 = vtanh.f32 %v651_v52  ;;  %v1947_v58 = vmul.f32 -1.442695, %v651_v52 }
 0x683   :  { %v2116_v54 = vpop.f32.mrf.mxu0  ;;  %2298 = vpow2.f32 %v1944_v57 }
 0x684   :  { %2300 = vpow2.f32 %v1947_v58 }
 0x687   :  { %v2295_v55 = vpop.eup %2294 }
 0x688   :  { %546 = vrot.lane.b32.xlu0 %v2295_v55, %s2523_s4 }
 0x68f   :  { %v2297_v56 = vpop.eup %2296 }
 0x690   :  { %664 = vrot.lane.b32.xlu1 %v2297_v56, %s2512_s30  ;;  %v2299_v59 = vpop.eup %2298 }
 0x691   :  { %v540_v60 = vadd.f32 1.0, %v2299_v59  ;;  %v2301_v61 = vpop.eup %2300 }
 0x692   :  { %v655_v62 = vadd.f32 1.0, %v2301_v61 }
 0x693   :  { %2302 = vrcp.f32 %v540_v60 }
 0x694   :  { %2304 = vrcp.f32 %v655_v62 }
 0x6a0   :  { %v2303_v63 = vpop.eup %2302 }
 0x6a1   :  { %v2305_v3 = vpop.eup %2304  ;;  %v544_v8 = vmul.f32 %v2303_v63, %v2685_v18 }
 0x6a2   :  { %v662_v13 = vmul.f32 %v2305_v3, %v660_v12 }
 0x6fa   :  { %v547_v1 = vpop.permute.xlu0 %546 }
 0x6fb   :  { %v549_v2 = vmul.f32 %v2303_v63, %v547_v1 }
 0x6fd   :  { %551 = vrot.lane.b32.xlu0 %v549_v2, %s2524_s17 }
 0x702   :  { %v665_v4 = vpop.permute.xlu1 %664 }
 0x703   :  { %v667_v5 = vmul.f32 %v2305_v3, %v665_v4 }
 0x705   :  { %669 = vrot.lane.b32.xlu1 %v667_v5, %s2522_s14 }
 0x76f   :  { %v552_v9 = vpop.permute.xlu0 %551 }
 0x770   :  { %v2726_v11 = vadd.f32 %v552_v9, %v544_v8 }
 0x772   :  { %2306 = vtanh.f32 %v2726_v11 }
 0x777   :  { %v670_v14 = vpop.permute.xlu1 %669 }
 0x778   :  { %v2730_v15 = vadd.f32 %v670_v14, %v662_v13 }
 0x77a   :  { %2308 = vtanh.f32 %v2730_v15 }
 0x77f   :  { %v2307_v16 = vpop.eup %2306 }
 0x780   :  { %557 = vrot.lane.b32.xlu0 %v2307_v16, %s2522_s14 }
 0x787   :  { %v2309_v20 = vpop.eup %2308 }
 0x788   :  { %675 = vrot.lane.b32.xlu1 %v2309_v20, %s2512_s30 }
 0x7f2   :  { %v558_v18 = vpop.permute.xlu0 %557 }
 0x7f3   :  { %v2735_v21 = vmul.f32 %v2303_v63, %v558_v18 }
 0x7f5   :  { %v561_v22 = vpack.c.bf16 %v2735_v21, %v2735_v21 }
 0x7f7   :  { %563 = vrot.lane.b32.xlu0 %v561_v22, %s2525_s18 }
 0x7fa   :  { %v676_v23 = vpop.permute.xlu1 %675 }
 0x7fb   :  { %v678_v24 = vmul.f32 %v2305_v3, %v676_v23  ;;  %v851_v3 = vrot.slane %v2730_v15, 6 }
 0x7fd   :  { %v679_v25 = vpack.c.bf16 %v678_v24, %v678_v24 }
 0x7ff   :  { %v681_v26 = vrot.slane %v679_v25, 2 }
 0x801   :  { %682 = vrot.lane.b32.xlu1 %v681_v26, %s2522_s14 }
 0x869   :  { %v564_v28 = vpop.permute.xlu0 %563 }
 0x86a   :  { %2106 = vmatmul.mubr.msk.bf16.vlgmr.msra.gmra.mxu1 %vm162_vm4, %v564_v28 }
 0x86b   :  { %2118 = vmatpush3.bf16.msra.mxu1 %v2648_v36  ;;  %2121 = vmatprep.mubr.msk.bf16.mxu1 %vm2520_vm0, %v2519_v0 }
 0x86c   :  { %2119 = vmatprep.subr.bf16.mxu1 %v2519_v0 }
 0x86f   :  { %2120 = vmatpush3.bf16.msra.mxu1 %v2654_v37 }
 0x870   :  { %2131 = vmatprep.subr.bf16.mxu1 %v2519_v0 }
 0x873   :  { %v683_v29 = vpop.permute.xlu1 %682 }
 0x874   :  { %2122 = vmatmul.mubr.msk.bf16.vlgmr.msra.gmra.mxu1 %vm218_vm3, %v683_v29 }
 0x875   :  { %2132 = vmatpush3.bf16.msra.mxu1 %v2607_v6  ;;  %2135 = vmatprep.mubr.msk.bf16.mxu1 %vm2520_vm0, %v2519_v0 }
 0x876   :  { %2133 = vmatprep.subr.bf16.mxu1 %v2519_v0 }
 0x879   :  { %2134 = vmatpush3.bf16.msra.mxu1 %v2614_v7 }
 0x87a   :  { %2147 = vmatprep.subr.bf16.mxu1 %v2519_v0 }
 0x87c   :  { %2136 = vmatmul.mubr.msk.bf16.vlgmr.msra.gmra.mxu1 %vm218_vm3, %v683_v29 }
 0x87d   :  { %2148 = vmatpush3.bf16.msra.mxu1 %v2645_v35  ;;  %2149 = vmatprep.mubr.msk.bf16.mxu1 %vm2520_vm0, %v2519_v0 }
 0x87e   :  { %2161 = vmatprep.subr.bf16.mxu1 %v2519_v0 }
 0x92a   :  { %v602_v30 = vpop.f32.mrf.mxu1 }
 0x92c   :  { %v2107_v31 = vpop.f32.mrf.mxu1 }
 0x92e   :  { %v605_v32 = vpop.f32.mrf.mxu1 }
 0x930   :  { %v2108_v33 = vpop.f32.mrf.mxu1 }
 0x934   :  { %v721_v34 = vpop.f32.mrf.mxu1 }
 0x935   :  { %v722_v38 = vadd.f32 %v721_v34, %v602_v30 }
 0x936   :  { %v2123_v39 = vpop.f32.mrf.mxu1 }
 0x937   :  { %v727_v40 = vadd.f32 %v722_v38, %v2677_v48 }
 0x938   :  { %v724_v41 = vpop.f32.mrf.mxu1 }
 0x939   :  { %2310 = vtanh.f32 %v727_v40  ;;  %v1949_v52 = vmul.f32 -1.442695, %v727_v40 }
 0x93a   :  { %v2124_v42 = vpop.f32.mrf.mxu1 }
 0x93c   :  { %v833_v43 = vpop.f32.mrf.mxu1 }
 0x93d   :  { %v840_v44 = vrot.slane %v833_v43, 2 }
 0x93e   :  { %v2137_v45 = vpop.f32.mrf.mxu1 }
 0x93f   :  { %v842_v46 = vadd.f32 %v840_v44, %v2634_v19 }
 0x940   :  { %v836_v47 = vpop.f32.mrf.mxu1 }
 0x941   :  { %2312 = vtanh.f32 %v842_v46  ;;  %v1952_v53 = vmul.f32 -1.442695, %v842_v46 }
 0x942   :  { %v2138_v49 = vpop.f32.mrf.mxu1  ;;  %2314 = vpow2.f32 %v1949_v52 }
 0x943   :  { %2316 = vpow2.f32 %v1952_v53 }
 0x946   :  { %v2311_v50 = vpop.eup %2310 }
 0x947   :  { %737 = vrot.lane.b32.xlu0 %v2311_v50, %s2523_s4 }
 0x94e   :  { %v2313_v51 = vpop.eup %2312 }
 0x94f   :  { %855 = vrot.lane.b32.xlu1 %v2313_v51, %s2512_s30  ;;  %v2315_v54 = vpop.eup %2314 }
 0x950   :  { %v731_v55 = vadd.f32 1.0, %v2315_v54  ;;  %v2317_v56 = vpop.eup %2316 }
 0x951   :  { %v846_v57 = vadd.f32 1.0, %v2317_v56 }
 0x952   :  { %2318 = vrcp.f32 %v731_v55 }
 0x953   :  { %2320 = vrcp.f32 %v846_v57 }
 0x95f   :  { %v2319_v19 = vpop.eup %2318 }
 0x960   :  { %v2321_v60 = vpop.eup %2320  ;;  %v735_v63 = vmul.f32 %v2319_v19, %v2726_v11  ;;  %v1704_v11 = vrot.slane %v2735_v21, 6 }
 0x961   :  { %v853_v4 = vmul.f32 %v2321_v60, %v851_v3 }
 0x962   :  { %v1722_v20 = vsel %vm1721_vm5, %v2694_v27, %v1704_v11 }
 0x9b9   :  { %v738_v58 = vpop.permute.xlu0 %737 }
 0x9ba   :  { %v740_v59 = vmul.f32 %v2319_v19, %v738_v58 }
 0x9bc   :  { %742 = vrot.lane.b32.xlu0 %v740_v59, %s2524_s17 }
 0x9c1   :  { %v856_v61 = vpop.permute.xlu1 %855 }
 0x9c2   :  { %v858_v62 = vmul.f32 %v2321_v60, %v856_v61 }
 0x9c4   :  { %860 = vrot.lane.b32.xlu1 %v858_v62, %s2522_s14 }
 0xa2e   :  { %v743_v1 = vpop.permute.xlu0 %742 }
 0xa2f   :  { %v2767_v2 = vadd.f32 %v743_v1, %v735_v63 }
 0xa31   :  { %2322 = vtanh.f32 %v2767_v2 }
 0xa36   :  { %v861_v5 = vpop.permute.xlu1 %860 }
 0xa37   :  { %v2771_v8 = vadd.f32 %v861_v5, %v853_v4 }
 0xa39   :  { %2324 = vtanh.f32 %v2771_v8  ;;  %v1039_v62 = vrot.slane %v2771_v8, 6 }
 0xa3e   :  { %v2323_v9 = vpop.eup %2322 }
 0xa3f   :  { %748 = vrot.lane.b32.xlu0 %v2323_v9, %s2522_s14 }
 0xa46   :  { %v2325_v12 = vpop.eup %2324 }
 0xa47   :  { %866 = vrot.lane.b32.xlu1 %v2325_v12, %s2512_s30 }
 0xab1   :  { %v749_v13 = vpop.permute.xlu0 %748 }
 0xab2   :  { %v751_v14 = vmul.f32 %v2319_v19, %v749_v13 }
 0xab4   :  { %v752_v16 = vpack.c.bf16 %v751_v14, %v751_v14  ;;  %v1707_v15 = vrot.slane %v751_v14, 4 }
 0xab6   :  { %754 = vrot.lane.b32.xlu0 %v752_v16, %s2525_s18  ;;  %v2781_v18 = vsel %vm1723_vm6, %v1722_v20, %v1707_v15 }
 0xab9   :  { %v867_v22 = vpop.permute.xlu1 %866 }
 0xaba   :  { %v869_v23 = vmul.f32 %v2321_v60, %v867_v22 }
 0xabc   :  { %v870_v24 = vpack.c.bf16 %v869_v23, %v869_v23 }
 0xabe   :  { %v872_v25 = vrot.slane %v870_v24, 3 }
 0xac0   :  { %873 = vrot.lane.b32.xlu1 %v872_v25, %s2522_s14 }
 0xb28   :  { %v755_v21 = vpop.permute.xlu0 %754 }
 0xb29   :  { %2128 = vmatmul.mubr.msk.bf16.vlgmr.msra.gmra.mxu0 %vm162_vm4, %v755_v21 }
 0xb2a   :  { %2140 = vmatpush3.bf16.msra.mxu0 %v2648_v36  ;;  %2143 = vmatprep.mubr.msk.bf16.mxu0 %vm2520_vm0, %v2519_v0 }
 0xb2b   :  { %2141 = vmatprep.subr.bf16.mxu0 %v2519_v0 }
 0xb2e   :  { %2142 = vmatpush3.bf16.msra.mxu0 %v2654_v37 }
 0xb2f   :  { %2153 = vmatprep.subr.bf16.mxu0 %v2519_v0 }
 0xb32   :  { %v874_v27 = vpop.permute.xlu1 %873 }
 0xb33   :  { %2144 = vmatmul.mubr.msk.bf16.vlgmr.msra.gmra.mxu0 %vm218_vm3, %v874_v27 }
 0xb34   :  { %2154 = vmatpush3.bf16.msra.mxu0 %v2607_v6  ;;  %2157 = vmatprep.mubr.msk.bf16.mxu0 %vm2520_vm0, %v2519_v0 }
 0xb35   :  { %2155 = vmatprep.subr.bf16.mxu0 %v2519_v0 }
 0xb38   :  { %2156 = vmatpush3.bf16.msra.mxu0 %v2614_v7 }
 0xb39   :  { %2169 = vmatprep.subr.bf16.mxu0 %v2519_v0 }
 0xb3b   :  { %2158 = vmatmul.mubr.msk.bf16.vlgmr.msra.gmra.mxu0 %vm218_vm3, %v874_v27 }
 0xb3c   :  { %2170 = vmatpush3.bf16.msra.mxu0 %v2645_v35  ;;  %2171 = vmatprep.mubr.msk.bf16.mxu0 %vm2520_vm0, %v2519_v0 }
 0xb3d   :  { %2183 = vmatprep.subr.bf16.mxu0 %v2519_v0 }
 0xbe9   :  { %v793_v26 = vpop.f32.mrf.mxu0 }
 0xbeb   :  { %v2129_v28 = vpop.f32.mrf.mxu0 }
 0xbed   :  { %v796_v29 = vpop.f32.mrf.mxu0 }
 0xbef   :  { %v2130_v30 = vpop.f32.mrf.mxu0 }
 0xbf3   :  { %v912_v31 = vpop.f32.mrf.mxu0 }
 0xbf4   :  { %v913_v32 = vadd.f32 %v912_v31, %v793_v26 }
 0xbf5   :  { %v2145_v33 = vpop.f32.mrf.mxu0 }
 0xbf6   :  { %v918_v34 = vadd.f32 %v913_v32, %v2677_v48 }
 0xbf7   :  { %v915_v38 = vpop.f32.mrf.mxu0 }
 0xbf8   :  { %2326 = vtanh.f32 %v918_v34  ;;  %v1954_v47 = vmul.f32 -1.442695, %v918_v34 }
 0xbf9   :  { %v2146_v39 = vpop.f32.mrf.mxu0 }
 0xbfb   :  { %v1024_v40 = vpop.f32.mrf.mxu0 }
 0xbfc   :  { %v1030_v41 = vadd.f32 %v1024_v40, %v2632_v17 }
 0xbfd   :  { %v2159_v42 = vpop.f32.mrf.mxu0 }
 0xbfe   :  { %2328 = vtanh.f32 %v1030_v41  ;;  %v1957_v49 = vmul.f32 -1.442695, %v1030_v41 }
 0xbff   :  { %v1027_v43 = vpop.f32.mrf.mxu0  ;;  %2330 = vpow2.f32 %v1954_v47 }
 0xc00   :  { %2332 = vpow2.f32 %v1957_v49 }
 0xc01   :  { %v2160_v44 = vpop.f32.mrf.mxu0 }
 0xc05   :  { %v2327_v45 = vpop.eup %2326 }
 0xc06   :  { %928 = vrot.lane.b32.xlu0 %v2327_v45, %s2523_s4 }
 0xc0b   :  { %v2329_v46 = vpop.eup %2328 }
 0xc0c   :  { %1043 = vrot.lane.b32.xlu1 %v2329_v46, %s2512_s30  ;;  %v2331_v50 = vpop.eup %2330 }
 0xc0d   :  { %v922_v51 = vadd.f32 1.0, %v2331_v50  ;;  %v2333_v52 = vpop.eup %2332 }
 0xc0e   :  { %v1034_v53 = vadd.f32 1.0, %v2333_v52 }
 0xc0f   :  { %2334 = vrcp.f32 %v922_v51 }
 0xc10   :  { %2336 = vrcp.f32 %v1034_v53 }
 0xc1c   :  { %v2335_v54 = vpop.eup %2334 }
 0xc1d   :  { %v2337_v57 = vpop.eup %2336  ;;  %v926_v59 = vmul.f32 %v2335_v54, %v2767_v2 }
 0xc1e   :  { %v1041_v63 = vmul.f32 %v2337_v57, %v1039_v62 }
 0xc78   :  { %v929_v55 = vpop.permute.xlu0 %928 }
 0xc79   :  { %v931_v56 = vmul.f32 %v2335_v54, %v929_v55 }
 0xc7b   :  { %933 = vrot.lane.b32.xlu0 %v931_v56, %s2524_s17 }
 0xc7e   :  { %v1044_v19 = vpop.permute.xlu1 %1043 }
 0xc7f   :  { %v1046_v58 = vmul.f32 %v2337_v57, %v1044_v19 }
 0xc81   :  { %1048 = vrot.lane.b32.xlu1 %v1046_v58, %s2522_s14 }
 0xced   :  { %v934_v60 = vpop.permute.xlu0 %933 }
 0xcee   :  { %v2810_v61 = vadd.f32 %v934_v60, %v926_v59 }
 0xcf0   :  { %2338 = vtanh.f32 %v2810_v61 }
 0xcf3   :  { %v1049_v1 = vpop.permute.xlu1 %1048 }
 0xcf4   :  { %v2814_v3 = vadd.f32 %v1049_v1, %v1041_v63 }
 0xcf6   :  { %2340 = vtanh.f32 %v2814_v3 }
 0xcfd   :  { %v2339_v4 = vpop.eup %2338 }
 0xcfe   :  { %939 = vrot.lane.b32.xlu0 %v2339_v4, %s2522_s14 }
 0xd03   :  { %v2341_v5 = vpop.eup %2340 }
 0xd04   :  { %1054 = vrot.lane.b32.xlu1 %v2341_v5, %s2512_s30 }
 0xd70   :  { %v940_v2 = vpop.permute.xlu0 %939 }
 0xd71   :  { %v942_v9 = vmul.f32 %v2335_v54, %v940_v2 }
 0xd73   :  { %v943_v12 = vpack.c.bf16 %v942_v9, %v942_v9  ;;  %v1710_v11 = vrot.slane %v942_v9, 2 }
 0xd75   :  { %945 = vrot.lane.b32.xlu0 %v943_v12, %s2525_s18  ;;  %v2822_v8 = vsel %vm1725_vm7, %v2781_v18, %v1710_v11 }
 0xd76   :  { %v1055_v13 = vpop.permute.xlu1 %1054 }
 0xd77   :  { %v1057_v14 = vmul.f32 %v2337_v57, %v1055_v13  ;;  %v1229_v57 = vrot.slane %v2814_v3, 6 }
 0xd79   :  { %v1058_v16 = vpack.c.bf16 %v1057_v14, %v1057_v14 }
 0xd7b   :  { %1060 = vrot.lane.b32.xlu1 %v1058_v16, %s2522_s14 }
 0xde7   :  { %v946_v15 = vpop.permute.xlu0 %945 }
 0xde8   :  { %2150 = vmatmul.mubr.msk.bf16.vlgmr.msra.gmra.mxu1 %vm162_vm4, %v946_v15 }
 0xde9   :  { %2162 = vmatpush3.bf16.msra.mxu1 %v2648_v36  ;;  %2165 = vmatprep.mubr.msk.bf16.mxu1 %vm2520_vm0, %v2519_v0 }
 0xdea   :  { %2163 = vmatprep.subr.bf16.mxu1 %v2519_v0 }
 0xded   :  { %2164 = vmatpush3.bf16.msra.mxu1 %v2654_v37  ;;  %v1061_v20 = vpop.permute.xlu1 %1060 }
 0xdee   :  { %2175 = vmatprep.subr.bf16.mxu1 %v2519_v0 }
 0xdf0   :  { %2166 = vmatmul.mubr.msk.bf16.vlgmr.msra.gmra.mxu1 %vm218_vm3, %v1061_v20 }
 0xdf1   :  { %2176 = vmatpush3.bf16.msra.mxu1 %v2607_v6  ;;  %2179 = vmatprep.mubr.msk.bf16.mxu1 %vm2520_vm0, %v2519_v0 }
 0xdf2   :  { %2177 = vmatprep.subr.bf16.mxu1 %v2519_v0 }
 0xdf5   :  { %2178 = vmatpush3.bf16.msra.mxu1 %v2614_v7 }
 0xdf6   :  { %2191 = vmatprep.subr.bf16.mxu1 %v2519_v0 }
 0xdf8   :  { %2180 = vmatmul.mubr.msk.bf16.vlgmr.msra.gmra.mxu1 %vm218_vm3, %v1061_v20 }
 0xdf9   :  { %2192 = vmatpush3.bf16.msra.mxu1 %v2645_v35  ;;  %2193 = vmatprep.mubr.msk.bf16.mxu1 %vm2520_vm0, %v2519_v0 }
 0xdfa   :  { %2205 = vmatprep.subr.bf16.mxu1 %v2519_v0 }
 0xea8   :  { %v984_v18 = vpop.f32.mrf.mxu1 }
 0xeaa   :  { %v2151_v22 = vpop.f32.mrf.mxu1 }
 0xeac   :  { %v987_v23 = vpop.f32.mrf.mxu1 }
 0xeae   :  { %v2152_v24 = vpop.f32.mrf.mxu1 }
 0xeb0   :  { %v1099_v25 = vpop.f32.mrf.mxu1 }
 0xeb1   :  { %v1100_v21 = vadd.f32 %v1099_v25, %v984_v18 }
 0xeb2   :  { %v2167_v27 = vpop.f32.mrf.mxu1 }
 0xeb3   :  { %v1105_v26 = vadd.f32 %v1100_v21, %v2677_v48 }
 0xeb4   :  { %v1102_v28 = vpop.f32.mrf.mxu1 }
 0xeb5   :  { %2342 = vtanh.f32 %v1105_v26  ;;  %v1959_v41 = vmul.f32 -1.442695, %v1105_v26 }
 0xeb6   :  { %v2168_v29 = vpop.f32.mrf.mxu1 }
 0xeb8   :  { %v1211_v30 = vpop.f32.mrf.mxu1 }
 0xeb9   :  { %v1218_v31 = vrot.slane %v1211_v30, 6 }
 0xeba   :  { %v2181_v32 = vpop.f32.mrf.mxu1 }
 0xebb   :  { %v1220_v33 = vadd.f32 %v1218_v31, %v2632_v17 }
 0xebc   :  { %v1214_v34 = vpop.f32.mrf.mxu1 }
 0xebd   :  { %2344 = vtanh.f32 %v1220_v33  ;;  %v1962_v42 = vmul.f32 -1.442695, %v1220_v33 }
 0xebe   :  { %v2182_v38 = vpop.f32.mrf.mxu1  ;;  %2346 = vpow2.f32 %v1959_v41 }
 0xebf   :  { %2348 = vpow2.f32 %v1962_v42 }
 0xec2   :  { %v2343_v39 = vpop.eup %2342 }
 0xec3   :  { %1115 = vrot.lane.b32.xlu0 %v2343_v39, %s2523_s4 }
 0xeca   :  { %v2345_v40 = vpop.eup %2344 }
 0xecb   :  { %1233 = vrot.lane.b32.xlu1 %v2345_v40, %s2512_s30  ;;  %v2347_v43 = vpop.eup %2346 }
 0xecc   :  { %v1109_v44 = vadd.f32 1.0, %v2347_v43  ;;  %v2349_v45 = vpop.eup %2348 }
 0xecd   :  { %v1224_v46 = vadd.f32 1.0, %v2349_v45 }
 0xece   :  { %2350 = vrcp.f32 %v1109_v44 }
 0xecf   :  { %2352 = vrcp.f32 %v1224_v46 }
 0xedb   :  { %v2351_v47 = vpop.eup %2350 }
 0xedc   :  { %v2353_v51 = vpop.eup %2352  ;;  %v1113_v54 = vmul.f32 %v2351_v47, %v2810_v61 }
 0xedd   :  { %v1231_v19 = vmul.f32 %v2353_v51, %v1229_v57 }
 0xf35   :  { %v1116_v49 = vpop.permute.xlu0 %1115 }
 0xf36   :  { %v1118_v50 = vmul.f32 %v2351_v47, %v1116_v49 }
 0xf38   :  { %1120 = vrot.lane.b32.xlu0 %v1118_v50, %s2524_s17 }
 0xf3d   :  { %v1234_v52 = vpop.permute.xlu1 %1233 }
 0xf3e   :  { %v1236_v53 = vmul.f32 %v2353_v51, %v1234_v52 }
 0xf40   :  { %1238 = vrot.lane.b32.xlu1 %v1236_v53, %s2522_s14 }
 0xfaa   :  { %v1121_v55 = vpop.permute.xlu0 %1120 }
 0xfab   :  { %v2851_v56 = vadd.f32 %v1121_v55, %v1113_v54 }
 0xfad   :  { %2354 = vtanh.f32 %v2851_v56 }
 0xfb2   :  { %v1239_v58 = vpop.permute.xlu1 %1238 }
 0xfb3   :  { %v2855_v59 = vadd.f32 %v1239_v58, %v1231_v19 }
 0xfb5   :  { %2356 = vtanh.f32 %v2855_v59 }
 0xfba   :  { %v2355_v60 = vpop.eup %2354 }
 0xfbb   :  { %1126 = vrot.lane.b32.xlu0 %v2355_v60, %s2522_s14 }
 0xfc2   :  { %v2357_v62 = vpop.eup %2356 }
 0xfc3   :  { %1244 = vrot.lane.b32.xlu1 %v2357_v62, %s2512_s30 }
0x102d   :  { %v1127_v61 = vpop.permute.xlu0 %1126 }
0x102e   :  { %v2860_v63 = vmul.f32 %v2351_v47, %v1127_v61  ;;  %v1420_v47 = vrot.slane %v2855_v59, 6  ;;  %v2398_v61 = vld [vmem:[%s2971_s2 + $0x8] sm:$0xff]  }
0x1030   :  { %v1130_v1 = vpack.c.bf16 %v2860_v63, %v2860_v63 }
0x1032   :  { %1132 = vrot.lane.b32.xlu0 %v1130_v1, %s2525_s18 }
0x1035   :  { %v1245_v3 = vpop.permute.xlu1 %1244 }
0x1036   :  { %v1247_v4 = vmul.f32 %v2353_v51, %v1245_v3 }
0x1038   :  { %v1248_v5 = vpack.c.bf16 %v1247_v4, %v1247_v4 }
0x103a   :  { %v1250_v2 = vrot.slane %v1248_v5, 1 }
0x103c   :  { %1251 = vrot.lane.b32.xlu1 %v1250_v2, %s2522_s14 }
0x10a4   :  { %v1133_v9 = vpop.permute.xlu0 %1132 }
0x10a5   :  { %2172 = vmatmul.mubr.msk.bf16.vlgmr.msra.gmra.mxu0 %vm162_vm4, %v1133_v9 }
0x10a6   :  { %2184 = vmatpush3.bf16.msra.mxu0 %v2648_v36  ;;  %2187 = vmatprep.mubr.msk.bf16.mxu0 %vm2520_vm0, %v2519_v0 }
0x10a7   :  { %2185 = vmatprep.subr.bf16.mxu0 %v2519_v0 }
0x10aa   :  { %2186 = vmatpush3.bf16.msra.mxu0 %v2654_v37 }
0x10ab   :  { %2197 = vmatprep.subr.bf16.mxu0 %v2519_v0 }
0x10ae   :  { %v1252_v12 = vpop.permute.xlu1 %1251 }
0x10af   :  { %2188 = vmatmul.mubr.msk.bf16.vlgmr.msra.gmra.mxu0 %vm218_vm3, %v1252_v12 }
0x10b0   :  { %2198 = vmatpush3.bf16.msra.mxu0 %v2607_v6  ;;  %2201 = vmatprep.mubr.msk.bf16.mxu0 %vm2520_vm0, %v2519_v0 }
0x10b1   :  { %2199 = vmatprep.subr.bf16.mxu0 %v2519_v0 }
0x10b4   :  { %2200 = vmatpush3.bf16.msra.mxu0 %v2614_v7 }
0x10b5   :  { %2213 = vmatprep.subr.bf16.mxu0 %v2519_v0 }
0x10b7   :  { %2202 = vmatmul.mubr.msk.bf16.vlgmr.msra.gmra.mxu0 %vm218_vm3, %v1252_v12 }
0x10b8   :  { %2214 = vmatpush3.bf16.msra.mxu0 %v2645_v35  ;;  %2215 = vmatprep.mubr.msk.bf16.mxu0 %vm2520_vm0, %v2519_v0 }
0x10b9   :  { %2227 = vmatprep.subr.bf16.mxu0 %v2519_v0 }
0x1165   :  { %v1171_v11 = vpop.f32.mrf.mxu0 }
0x1167   :  { %v2173_v6 = vpop.f32.mrf.mxu0 }
0x1169   :  { %v1174_v13 = vpop.f32.mrf.mxu0 }
0x116b   :  { %v2174_v14 = vpop.f32.mrf.mxu0 }
0x116f   :  { %v1290_v16 = vpop.f32.mrf.mxu0 }
0x1170   :  { %v1291_v15 = vadd.f32 %v1290_v16, %v1171_v11 }
0x1171   :  { %v2189_v20 = vpop.f32.mrf.mxu0 }
0x1172   :  { %v1296_v7 = vadd.f32 %v1291_v15, %v2677_v48 }
0x1173   :  { %v1293_v18 = vpop.f32.mrf.mxu0 }
0x1174   :  { %2358 = vtanh.f32 %v1296_v7  ;;  %v1964_v29 = vmul.f32 -1.442695, %v1296_v7 }
0x1175   :  { %v2190_v22 = vpop.f32.mrf.mxu0 }
0x1177   :  { %v1402_v23 = vpop.f32.mrf.mxu0 }
0x1178   :  { %v1409_v24 = vrot.slane %v1402_v23, 4 }
0x1179   :  { %v2203_v35 = vpop.f32.mrf.mxu0 }
0x117a   :  { %v1411_v25 = vadd.f32 %v1409_v24, %v2632_v17 }
0x117b   :  { %v1405_v21 = vpop.f32.mrf.mxu0 }
0x117c   :  { %2360 = vtanh.f32 %v1411_v25  ;;  %v1967_v30 = vmul.f32 -1.442695, %v1411_v25 }
0x117d   :  { %v2204_v27 = vpop.f32.mrf.mxu0  ;;  %2362 = vpow2.f32 %v1964_v29 }
0x117e   :  { %2364 = vpow2.f32 %v1967_v30 }
0x1181   :  { %v2359_v26 = vpop.eup %2358 }
0x1182   :  { %1306 = vrot.lane.b32.xlu0 %v2359_v26, %s2523_s4 }
0x1189   :  { %v2361_v28 = vpop.eup %2360 }
0x118a   :  { %1424 = vrot.lane.b32.xlu1 %v2361_v28, %s2512_s30  ;;  %v2363_v31 = vpop.eup %2362 }
0x118b   :  { %v1300_v32 = vadd.f32 1.0, %v2363_v31  ;;  %v2365_v33 = vpop.eup %2364 }
0x118c   :  { %v1415_v34 = vadd.f32 1.0, %v2365_v33 }
0x118d   :  { %2366 = vrcp.f32 %v1300_v32 }
0x118e   :  { %2368 = vrcp.f32 %v1415_v34 }
0x119a   :  { %v2367_v38 = vpop.eup %2366 }
0x119b   :  { %v2369_v41 = vpop.eup %2368  ;;  %v1304_v44 = vmul.f32 %v2367_v38, %v2851_v56 }
0x119c   :  { %v1422_v49 = vmul.f32 %v2369_v41, %v1420_v47 }
0x11f4   :  { %v1307_v39 = vpop.permute.xlu0 %1306 }
0x11f5   :  { %v1309_v40 = vmul.f32 %v2367_v38, %v1307_v39 }
0x11f7   :  { %1311 = vrot.lane.b32.xlu0 %v1309_v40, %s2524_s17 }
0x11fc   :  { %v1425_v42 = vpop.permute.xlu1 %1424 }
0x11fd   :  { %v1427_v43 = vmul.f32 %v2369_v41, %v1425_v42 }
0x11ff   :  { %1429 = vrot.lane.b32.xlu1 %v1427_v43, %s2522_s14 }
0x1269   :  { %v1312_v45 = vpop.permute.xlu0 %1311 }
0x126a   :  { %v2892_v46 = vadd.f32 %v1312_v45, %v1304_v44 }
0x126c   :  { %2370 = vtanh.f32 %v2892_v46 }
0x1271   :  { %v1430_v50 = vpop.permute.xlu1 %1429 }
0x1272   :  { %v2896_v51 = vadd.f32 %v1430_v50, %v1422_v49 }
0x1274   :  { %2372 = vtanh.f32 %v2896_v51 }
0x1279   :  { %v2371_v52 = vpop.eup %2370 }
0x127a   :  { %1317 = vrot.lane.b32.xlu0 %v2371_v52, %s2522_s14 }
0x1281   :  { %v2373_v53 = vpop.eup %2372 }
0x1282   :  { %1435 = vrot.lane.b32.xlu1 %v2373_v53, %s2512_s30 }
0x12ec   :  { %v1318_v54 = vpop.permute.xlu0 %1317 }
0x12ed   :  { %v2901_v55 = vmul.f32 %v2367_v38, %v1318_v54  ;;  %v1611_v38 = vrot.slane %v2896_v51, 6 }
0x12ef   :  { %v1321_v56 = vpack.c.bf16 %v2901_v55, %v2901_v55  ;;  %v1713_v44 = vrot.slane %v2901_v55, 6  ;;  %v2400_v55 = vld [vmem:[#allocation5 + $0x8] sm:$0xff]  }
0x12f1   :  { %1323 = vrot.lane.b32.xlu0 %v1321_v56, %s2525_s18  ;;  %v1727_v50 = vsel %vm1721_vm5, %v2860_v63, %v1713_v44  ;;  %v2401_v63 = vld [vmem:[#allocation5] sm:$0xff]  }
0x12f4   :  { %v1436_v57 = vpop.permute.xlu1 %1435 }
0x12f5   :  { %v1438_v19 = vmul.f32 %v2369_v41, %v1436_v57 }
0x12f7   :  { %v1439_v58 = vpack.c.bf16 %v1438_v19, %v1438_v19 }
0x12f9   :  { %v1441_v59 = vrot.slane %v1439_v58, 2 }
0x12fb   :  { %1442 = vrot.lane.b32.xlu1 %v1441_v59, %s2522_s14 }
0x1363   :  { %v1324_v60 = vpop.permute.xlu0 %1323 }
0x1364   :  { %2194 = vmatmul.mubr.msk.bf16.vlgmr.msra.gmra.mxu1 %vm162_vm4, %v1324_v60 }
0x1365   :  { %2206 = vmatpush3.bf16.msra.mxu1 %v2648_v36  ;;  %2209 = vmatprep.mubr.msk.bf16.mxu1 %vm2520_vm0, %v2519_v0  ;;  %v2399_v36 = vld [vmem:[%s2971_s2] sm:$0xff]  }
0x1366   :  { %2207 = vmatprep.subr.bf16.mxu1 %v2519_v0 }
0x1369   :  { %2208 = vmatpush3.bf16.msra.mxu1 %v2654_v37 }
0x136a   :  { %2219 = vmatprep.subr.bf16.mxu1 %v2519_v0 }
0x136d   :  { %v1443_v62 = vpop.permute.xlu1 %1442 }
0x136e   :  { %2210 = vmatmul.mubr.msk.bf16.vlgmr.msra.gmra.mxu1 %vm218_vm3, %v1443_v62 }
0x136f   :  { %2220 = vmatpush3.bf16.msra.mxu1 %v2398_v61  ;;  %2223 = vmatprep.mubr.msk.bf16.mxu1 %vm2520_vm0, %v2519_v0 }
0x1370   :  { %2221 = vmatprep.subr.bf16.mxu1 %v2519_v0 }
0x1373   :  { %2222 = vmatpush3.bf16.msra.mxu1 %v2399_v36 }
0x1376   :  { %2224 = vmatmul.mubr.msk.bf16.vlgmr.msra.gmra.mxu1 %vm218_vm3, %v1443_v62 }
0x1424   :  { %v1362_v37 = vpop.f32.mrf.mxu1 }
0x1426   :  { %v2195_v1 = vpop.f32.mrf.mxu1 }
0x1428   :  { %v1365_v3 = vpop.f32.mrf.mxu1 }
0x142a   :  { %v2196_v4 = vpop.f32.mrf.mxu1 }
0x142e   :  { %v1481_v5 = vpop.f32.mrf.mxu1 }
0x142f   :  { %v1482_v2 = vadd.f32 %v1481_v5, %v1362_v37 }
0x1430   :  { %v2211_v9 = vpop.f32.mrf.mxu1 }
0x1431   :  { %v1487_v12 = vadd.f32 %v1482_v2, %v2677_v48 }
0x1432   :  { %v1484_v11 = vpop.f32.mrf.mxu1 }
0x1433   :  { %2374 = vtanh.f32 %v1487_v12  ;;  %v1969_v23 = vmul.f32 -1.442695, %v1487_v12 }
0x1434   :  { %v2212_v6 = vpop.f32.mrf.mxu1 }
0x1436   :  { %v1593_v13 = vpop.f32.mrf.mxu1 }
0x1437   :  { %v1600_v14 = vrot.slane %v1593_v13, 2 }
0x1438   :  { %v2225_v16 = vpop.f32.mrf.mxu1 }
0x1439   :  { %v1602_v15 = vadd.f32 %v1600_v14, %v2632_v17 }
0x143a   :  { %v1596_v20 = vpop.f32.mrf.mxu1 }
0x143b   :  { %2376 = vtanh.f32 %v1602_v15  ;;  %v1972_v24 = vmul.f32 -1.442695, %v1602_v15  ;;  %v1731_v15 = vld [vmem:[#allocation7 + $0x8] sm:$0xff]  ;;  %v1730_v20 = vld [vmem:[#allocation7] sm:$0xff] }
0x143c   :  { %v2226_v7 = vpop.f32.mrf.mxu1  ;;  %2378 = vpow2.f32 %v1969_v23  ;;  %2235 = vmatprep.subr.mxu1 %v1731_v15 }
0x143d   :  { %2380 = vpow2.f32 %v1972_v24  ;;  %2236 = vmatpush3.msra.mxu1 %v1731_v15 }
0x143e   :  { %2237 = vmatprep.subr.mxu1 %v1730_v20 }
0x143f   :  { %2238 = vmatpush3.msra.mxu1 %v1730_v20 }
0x1440   :  { %v2375_v18 = vpop.eup %2374 }
0x1441   :  { %1497 = vrot.lane.b32.xlu0 %v2375_v18, %s2523_s4 }
0x1448   :  { %v2377_v22 = vpop.eup %2376 }
0x1449   :  { %1615 = vrot.lane.b32.xlu1 %v2377_v22, %s2512_s30  ;;  %v2379_v35 = vpop.eup %2378 }
0x144a   :  { %v1491_v25 = vadd.f32 1.0, %v2379_v35  ;;  %v2381_v21 = vpop.eup %2380  ;;  %v1824_v35 = vld [vmem:[#allocation8 + $0x8] sm:$0xff] }
0x144b   :  { %v1606_v27 = vadd.f32 1.0, %v2381_v21  ;;  %2242 = vmatprep.subr.mxu1 %v1824_v35  ;;  %v1734_v21 = vsub.s32 2, %v2623_v10 }
0x144c   :  { %2382 = vrcp.f32 %v1491_v25  ;;  %v1823_v25 = vld [vmem:[#allocation8] sm:$0xff] }
0x144d   :  { %2384 = vrcp.f32 %v1606_v27  ;;  %v2402_v27 = vld [vmem:[%s2976_s7] sm:$0xf]  ;;  %s2483_s7 = scalar_lea.vmem %s1918_s25, 256 }
0x144e   :  { %p2484_p6 = scmp.ne.s32.totalorder %s1918_s25, %s2483_s7  ;;  %p2489_p8 = scmp.lt.s32.totalorder %s2483_s7, %s2483_s7 }
0x1450   :  { %p2490_p9 = por %p2489_p8, %p2488_p7 }
0x1452   :  { %p2491_p10 = pnand %p2490_p9, %p2484_p6 }
0x1459   :  { %v2383_v17 = vpop.eup %2382 }
0x145a   :  { %v2385_v29 = vpop.eup %2384  ;;  %v1495_v32 = vmul.f32 %v2383_v17, %v2892_v46 }
0x145b   :  { %v1613_v39 = vmul.f32 %v2385_v29, %v1611_v38 }
0x14b3   :  { %v1498_v26 = vpop.permute.xlu0 %1497 }
0x14b4   :  { %v1500_v28 = vmul.f32 %v2383_v17, %v1498_v26 }
0x14b6   :  { %1502 = vrot.lane.b32.xlu0 %v1500_v28, %s2524_s17 }
0x14bb   :  { %v1616_v30 = vpop.permute.xlu1 %1615 }
0x14bc   :  { %v1618_v31 = vmul.f32 %v2385_v29, %v1616_v30 }
0x14be   :  { %1620 = vrot.lane.b32.xlu1 %v1618_v31, %s2522_s14 }
0x1528   :  { %v1503_v33 = vpop.permute.xlu0 %1502 }
0x1529   :  { %v1505_v34 = vadd.f32 %v1503_v33, %v1495_v32  ;;  %v1827_v33 = vsub.s32 3, %v2623_v10 }
0x152b   :  { %2386 = vtanh.f32 %v1505_v34 }
0x1530   :  { %v1621_v40 = vpop.permute.xlu1 %1620 }
0x1531   :  { %v1623_v41 = vadd.f32 %v1621_v40, %v1613_v39 }
0x1533   :  { %2388 = vtanh.f32 %v1623_v41 }
0x1538   :  { %v2387_v42 = vpop.eup %2386 }
0x1539   :  { %1508 = vrot.lane.b32.xlu0 %v2387_v42, %s2522_s14 }
0x1540   :  { %v2389_v43 = vpop.eup %2388 }
0x1541   :  { %1626 = vrot.lane.b32.xlu1 %v2389_v43, %s2512_s30 }
0x15ab   :  { %v1509_v45 = vpop.permute.xlu0 %1508 }
0x15ac   :  { %v1511_v47 = vmul.f32 %v2383_v17, %v1509_v45  ;;  %v1735_v17 = vrot.slane %v2402_v27, %v1734_v21 }
0x15ae   :  { %v1512_v46 = vpack.c.bf16 %v1511_v47, %v1511_v47  ;;  %v1716_v49 = vrot.slane %v1511_v47, 4 }
0x15b0   :  { %1514 = vrot.lane.b32.xlu0 %v1512_v46, %s2525_s18  ;;  %v1728_v51 = vsel %vm1723_vm6, %v1727_v50, %v1716_v49 }
0x15b3   :  { %v1627_v52 = vpop.permute.xlu1 %1626 }
0x15b4   :  { %v1629_v53 = vmul.f32 %v2385_v29, %v1627_v52 }
0x15b6   :  { %v1630_v54 = vpack.c.bf16 %v1629_v53, %v1629_v53 }
0x15b8   :  { %v1632_v56 = vrot.slane %v1630_v54, 3 }
0x15ba   :  { %1633 = vrot.lane.b32.xlu1 %v1632_v56, %s2522_s14 }
0x1622   :  { %v1515_v57 = vpop.permute.xlu0 %1514 }
0x1623   :  { %2216 = vmatmul.mubr.msk.bf16.vlgmr.msra.gmra.mxu0 %vm162_vm4, %v1515_v57 }
0x1624   :  { %2228 = vmatpush3.bf16.msra.mxu0 %v2400_v55  ;;  %2231 = vmatprep.mubr.msk.bf16.mxu0 %vm2520_vm0, %v2519_v0 }
0x1625   :  { %2229 = vmatprep.subr.bf16.mxu0 %v2519_v0 }
0x1628   :  { %2230 = vmatpush3.bf16.msra.mxu0 %v2401_v63 }
0x162c   :  { %v1634_v19 = vpop.permute.xlu1 %1633 }
0x162d   :  { %2232 = vmatmul.mubr.msk.bf16.vlgmr.msra.gmra.mxu0 %vm218_vm3, %v1634_v19 }
0x16e3   :  { %v1553_v58 = vpop.f32.mrf.mxu0 }
0x16e5   :  { %v2217_v59 = vpop.f32.mrf.mxu0 }
0x16e7   :  { %v1556_v60 = vpop.f32.mrf.mxu0 }
0x16e9   :  { %v2218_v62 = vpop.f32.mrf.mxu0 }
0x16ed   :  { %v1672_v61 = vpop.f32.mrf.mxu0 }
0x16ee   :  { %v1673_v36 = vadd.f32 %v1672_v61, %v1553_v58 }
0x16ef   :  { %v2233_v37 = vpop.f32.mrf.mxu0 }
0x16f0   :  { %v1678_v1 = vadd.f32 %v1673_v36, %v2677_v48 }
0x16f1   :  { %v1675_v3 = vpop.f32.mrf.mxu0 }
0x16f2   :  { %2390 = vtanh.f32 %v1678_v1  ;;  %v1974_v0 = vmul.f32 -1.442695, %v1678_v1 }
0x16f3   :  { %v2234_v4 = vpop.f32.mrf.mxu0 }
0x16f4   :  { %2392 = vpow2.f32 %v1974_v0 }
0x16ff   :  { %v2391_v5 = vpop.eup %2390 }
0x1700   :  { %1688 = vrot.lane.b32.xlu0 %v2391_v5, %s2523_s4 }
0x1701   :  { %v2393_v2 = vpop.eup %2392 }
0x1702   :  { %v1682_v9 = vadd.f32 1.0, %v2393_v2 }
0x1704   :  { %2394 = vrcp.f32 %v1682_v9 }
0x1711   :  { %v2395_v12 = vpop.eup %2394 }
0x1712   :  { %v1686_v48 = vmul.f32 %v2395_v12, %v1505_v34  ;;  %v1828_v34 = vrot.slane %v2402_v27, %v1827_v33 }
0x1772   :  { %v1689_v11 = vpop.permute.xlu0 %1688 }
0x1773   :  { %v1691_v6 = vmul.f32 %v2395_v12, %v1689_v11 }
0x1775   :  { %1693 = vrot.lane.b32.xlu1 %v1691_v6, %s2524_s17 }
0x1779   :  { %1738 = vrot.lane.b32.xlu1 %v2822_v8, %s2525_s18 }
0x17e7   :  { %v1694_v13 = vpop.permute.xlu1 %1693 }
0x17e8   :  { %v1696_v14 = vadd.f32 %v1694_v13, %v1686_v48 }
0x17ea   :  { %2396 = vtanh.f32 %v1696_v14 }
0x17eb   :  { %v1739_v16 = vpop.permute.xlu1 %1738 }
0x17ec   :  { %2239 = vmatprep.mubr.msk.f32.mxu1 %vm162_vm4, %v1739_v16 }
0x17f7   :  { %v2397_v7 = vpop.eup %2396 }
0x17f8   :  { %1699 = vrot.lane.b32.xlu0 %v2397_v7, %s2522_s14 }
0x186a   :  { %v1700_v18 = vpop.permute.xlu0 %1699 }
0x186b   :  { %v1702_v22 = vmul.f32 %v2395_v12, %v1700_v18 }
0x186d   :  { %v1719_v23 = vrot.slane %v1702_v22, 2 }
0x186f   :  { %v1729_v8 = vsel %vm1725_vm7, %v1728_v51, %v1719_v23 }
0x1870   :  { %1740 = vrot.lane.b32.xlu0 %v1729_v8, %s2525_s18 }
0x18e2   :  { %v1741_v24 = vpop.permute.xlu0 %1740 }
0x18e3   :  { %2240 = vmatmul.mubr.msk.f32.vlgmr.msra.gmra.mxu1 %vm162_vm4, %v1741_v24 }
0x18e4   :  { %2243 = vmatpush3.msra.mxu1 %v1824_v35 }
0x18e5   :  { %2244 = vmatprep.subr.mxu1 %v1823_v25 }
0x18e6   :  { %2245 = vmatpush3.msra.mxu1 %v1823_v25 }
0x19a3   :  { %v2241_v26 = vpop.f32.mrf.mxu1 }
0x19a4   :  { %v1818_v28 = vadd.f32 %v2241_v26, %v1735_v17 }
0x19a5   :  { %v1812_v29 = vpop.f32.mrf.mxu1 }
0x19a6   :  { %v1813_v30 = vadd.f32 %v1812_v29, %v1735_v17  ;;  %v1822_v32 = vmax.f32 %v1818_v28, 0.0 }
0x19a8   :  { %v1821_v31 = vmax.f32 %v1813_v30, 0.0 }
0x19aa   :  { %2246 = vmatprep.mubr.msk.f32.mxu1 %vm162_vm4, %v1821_v31 }
0x19ab   :  { %2247 = vmatmul.mubr.msk.f32.vlgmr.msra.gmra.mxu1 %vm162_vm4, %v1822_v32 }
0x1a6b   :  { %v2248_v38 = vpop.f32.mrf.mxu1 }
0x1a6c   :  { %v1907_v39 = vadd.f32 %v2248_v38, %v1828_v34 }
0x1a6d   :  { %v1901_v40 = vpop.f32.mrf.mxu1 }
0x1a6e   :  { %1911 = vst [vmem:[#allocation10 + $0x8] sm:$0xff] %v1907_v39  ;;  %v1902_v41 = vadd.f32 %v1901_v40, %v1828_v34 }
0x1a70   :  { %1910 = vst [vmem:[#allocation10] sm:$0xff] %v1902_v41 }
0x1a71   :  { %2494 = shalt.err (!%p2491_p10)
}
0x1a72   :  { %1923 = dma.vmem_to_hbm [thread:$0]  %s1918_s25, 256, %s2977_s8, [#allocation4], %s2516_s3, %s2516_s3, %s2517_s21  }
0x1a73   :  { %2509 = dma.done.wait [#allocation4], 256  }
0x1a74   :  { %2510 = vsyncadd [#allocation4], 4294967040 }
0x1a75   :  { %1927 = vsyncpa [#allocation3], 1 }
0x1a76   :  { %1928 = vsyncpa [#allocation6], 1 }
0x1a77   :  { %1929 = vsyncpa [#allocation9], 1 }
0x1a78   :  { %1930 = vsyncpa [#allocation4], 1 }

</bundles_post_ra>
